<compile_context>
chip_gen: v7x
topology: tpu7x:2x2x1
jax: 0.10.0
libtpu: 0.0.40
codegen_flags: <defaults>
</compile_context>

<pallas_src>
import jax
import jax.numpy as jnp
import numpy as np
from jax.experimental import pallas as pl
from jax.experimental.pallas import tpu as pltpu


# ----------------------------------------------------------------------------
# Padding / tiling policy
# ----------------------------------------------------------------------------
def _round_up(x, m):
    return ((x + m - 1) // m) * m


def _choose_tiling(n):
    """Return (n_pad, tile) for the node dimension.

    <=1024 padded nodes: one full-extent tile (no grid overhead, no waste).
    Otherwise: pad N to a multiple of 256 and use the largest of
    {1024, 512, 256} dividing it -> lane-dense tiles, never 128-wide fallback.
    """
    n0 = _round_up(max(n, 128), 128)
    if n0 <= 1024:
        return n0, n0
    n_pad = _round_up(n0, 256)
    for t in (1024, 512, 256):
        if n_pad % t == 0:
            return n_pad, t
    return n_pad, 256  # unreachable (n_pad is a multiple of 256)


def _tile_for(n_pad):
    """Tile size implied by an already-padded node count (matches above)."""
    if n_pad <= 1024:
        return n_pad
    for t in (1024, 512, 256):
        if n_pad % t == 0:
            return t
    return 256


# ----------------------------------------------------------------------------
# Kernels
# ----------------------------------------------------------------------------
def _elu(z):
    # F.elu, alpha = 1.0 (computed in f32)
    return jnp.where(z > 0, z, jnp.exp(z) - 1.0)


def _xw_kernel(x_ref, w_ref, o_ref):
    """Row-tiled feature transform: HW = X @ W (bf16 MXU, f32 acc)."""
    o_ref[...] = jnp.dot(x_ref[...], w_ref[...],
                         preferred_element_type=jnp.float32).astype(o_ref.dtype)


def _accumulate(a_ref, hw_ref, acc_ref):
    """acc += A_tile @ HW_block over the reduction (k) grid axis."""
    k = pl.program_id(1)

    @pl.when(k == 0)
    def _():
        acc_ref[...] = jnp.zeros_like(acc_ref)

    acc_ref[...] += jnp.dot(a_ref[...], hw_ref[...],
                            preferred_element_type=jnp.float32)


def _conv1_kernel(a_ref, hw_ref, b_ref, wnext_ref, x_out_ref, hwnext_ref,
                  acc_ref):
    """x1 = elu(A @ HW1 + b1); epilogue also emits HW2 = x1 @ W2.

    NOTE: padded node ROWS of x1/HW2 contain elu(b1)-derived garbage; this is
    harmless because the corresponding A_hat COLUMNS are zero, but do not read
    these intermediates beyond the real node count.
    """
    _accumulate(a_ref, hw_ref, acc_ref)

    @pl.when(pl.program_id(1) == pl.num_programs(1) - 1)
    def _():
        x = _elu(acc_ref[...] + b_ref[...])
        xb = x.astype(x_out_ref.dtype)
        x_out_ref[...] = xb
        hwnext_ref[...] = jnp.dot(
            xb, wnext_ref[...],
            preferred_element_type=jnp.float32).astype(hwnext_ref.dtype)


def _conv2_kernel(a_ref, hw_ref, b_ref, x1_ref, wres_ref, whead_ref,
                  hwhead_ref, acc_ref):
    """x_comb = elu(A @ HW2 + b2) + w_res * x1 (residual fused); epilogue
    emits HW_head = x_comb @ [W_mu | W_logstd] directly -> x_comb never
    materializes in HBM."""
    _accumulate(a_ref, hw_ref, acc_ref)

    @pl.when(pl.program_id(1) == pl.num_programs(1) - 1)
    def _():
        xc = _elu(acc_ref[...] + b_ref[...]) \
            + wres_ref[0] * x1_ref[...].astype(jnp.float32)
        hwhead_ref[...] = jnp.dot(
            xc.astype(whead_ref.dtype), whead_ref[...],
            preferred_element_type=jnp.float32).astype(hwhead_ref.dtype)


def _head_kernel(a_ref, hw_ref, b_ref, o_ref, acc_ref):
    """[mu | logstd] = A @ HW_head + b_head (no activation), f32 output."""
    _accumulate(a_ref, hw_ref, acc_ref)

    @pl.when(pl.program_id(1) == pl.num_programs(1) - 1)
    def _():
        o_ref[...] = (acc_ref[...] + b_ref[...]).astype(o_ref.dtype)


# ----------------------------------------------------------------------------
# pallas_call wrappers
# ----------------------------------------------------------------------------
def _feature_transform(x_pad, w, tile):
    """HW = X @ W, tiled over node rows only (feature dims are small)."""
    n_pad, f_in = x_pad.shape
    f_out = w.shape[1]
    return pl.pallas_call(
        _xw_kernel,
        out_shape=jax.ShapeDtypeStruct((n_pad, f_out), jnp.bfloat16),
        grid_spec=pltpu.PrefetchScalarGridSpec(
            num_scalar_prefetch=0,
            grid=(n_pad // tile,),
            in_specs=[pl.BlockSpec((tile, f_in), lambda i: (i, 0)),
                      pl.BlockSpec((f_in, f_out), lambda i: (0, 0))],
            out_specs=pl.BlockSpec((tile, f_out), lambda i: (i, 0)),
        ),
        compiler_params=pltpu.CompilerParams(
            dimension_semantics=("parallel",)),
    )(x_pad, w)


def _agg_call(kernel, a_pad, hw, bias, extra_args, extra_specs, out_shapes,
              out_specs, tile):
    """Tiled aggregation out = epilogue(A_hat @ HW + b): grid (rows, cols),
    row axis parallel, reduction axis arbitrary, f32 VMEM accumulator."""
    n_pad = a_pad.shape[0]
    f_out = hw.shape[1]
    grid = (n_pad // tile, n_pad // tile)
    # TODO(synk): sweep pipeline_mode=pl.Buffered(3) on the A_hat spec.
    in_specs = [
        pl.BlockSpec((tile, tile), lambda i, k: (i, k)),    # A_hat tile
        pl.BlockSpec((tile, f_out), lambda i, k: (k, 0)),   # HW column block
        pl.BlockSpec((1, f_out), lambda i, k: (0, 0)),      # bias (f32)
    ] + list(extra_specs)
    return pl.pallas_call(
        kernel,
        out_shape=out_shapes,
        grid_spec=pltpu.PrefetchScalarGridSpec(
            num_scalar_prefetch=0,
            grid=grid,
            in_specs=in_specs,
            out_specs=out_specs,
            scratch_shapes=[pltpu.VMEM((tile, f_out), jnp.float32)],
        ),
        compiler_params=pltpu.CompilerParams(
            dimension_semantics=("parallel", "arbitrary")),
    )(a_pad, hw, bias, *extra_args)


# ----------------------------------------------------------------------------
# One-time preprocessing (hoisted OUT of the per-forward path)
# ----------------------------------------------------------------------------
def _pad2(a, rows, cols):
    return jnp.pad(a, ((0, rows - a.shape[0]), (0, cols - a.shape[1])))


def prepare_adjacency(a_hat, n_pad):
    """Pad + bf16-cast A_hat once; the jitted forward consumes this directly."""
    n = a_hat.shape[0]
    return _pad2(a_hat, n_pad, n_pad).astype(jnp.bfloat16)


def prepare_params(params, in_channels, hidden_channels, out_channels):
    """Pad / cast weights once. Zero padding keeps real-node results exact."""
    in_pad = _round_up(max(in_channels, 128), 128)
    hid_pad = _round_up(max(hidden_channels, 128), 128)
    out2_pad = _round_up(max(2 * out_channels, 128), 128)
    bf16 = jnp.bfloat16
    w_head = jnp.concatenate([params["w_mu"], params["w_logstd"]], axis=1)
    b_head = jnp.concatenate([params["b_mu"], params["b_logstd"]], axis=1)
    return {
        "w1": _pad2(params["w1"], in_pad, hid_pad).astype(bf16),
        "b1": _pad2(params["b1"], 1, hid_pad).astype(jnp.float32),
        "w2": _pad2(params["w2"], hid_pad, hid_pad).astype(bf16),
        "b2": _pad2(params["b2"], 1, hid_pad).astype(jnp.float32),
        "w_head": _pad2(w_head, hid_pad, out2_pad).astype(bf16),
        "b_head": _pad2(b_head, 1, out2_pad).astype(jnp.float32),
        "w_res": params["w_residual"].reshape(1).astype(jnp.float32),
    }


# ----------------------------------------------------------------------------
# Encoder forward
# ----------------------------------------------------------------------------
@jax.jit
def _encoder_forward(a_pad, x, prep):
    n_pad = a_pad.shape[0]
    tile = _tile_for(n_pad)
    n, in_c = x.shape
    in_pad, hid_pad = prep["w1"].shape
    out2_pad = prep["w_head"].shape[1]

    # Node-feature pad/cast is cheap relative to the [n_pad, n_pad] stream.
    x_pad = jnp.zeros((n_pad, in_pad), jnp.bfloat16)
    x_pad = x_pad.at[:n, :in_c].set(x.astype(jnp.bfloat16))

    # HW1 = X @ W1 — hoisted out of the (i, k) aggregation loop.
    hw1 = _feature_transform(x_pad, prep["w1"], tile)

    # conv1: x1 = elu(A @ HW1 + b1); epilogue emits HW2 = x1 @ W2.
    x1, hw2 = _agg_call(
        _conv1_kernel, a_pad, hw1, prep["b1"],
        extra_args=[prep["w2"]],
        extra_specs=[pl.BlockSpec((hid_pad, hid_pad), lambda i, k: (0, 0))],
        out_shapes=(jax.ShapeDtypeStruct((n_pad, hid_pad), jnp.bfloat16),
                    jax.ShapeDtypeStruct((n_pad, hid_pad), jnp.bfloat16)),
        out_specs=(pl.BlockSpec((tile, hid_pad), lambda i, k: (i, 0)),
                   pl.BlockSpec((tile, hid_pad), lambda i, k: (i, 0))),
        tile=tile)

    # conv2 (+ fused residual): epilogue emits HW_head = x_comb @ [Wmu|Wls].
    hw_head = _agg_call(
        _conv2_kernel, a_pad, hw2, prep["b2"],
        extra_args=[x1, prep["w_res"], prep["w_head"]],
        extra_specs=[
            pl.BlockSpec((tile, hid_pad), lambda i, k: (i, 0)),     # x1 rows
            pl.BlockSpec(memory_space=pltpu.MemorySpace.SMEM),      # w_res
            pl.BlockSpec((hid_pad, out2_pad), lambda i, k: (0, 0)),  # W_head
        ],
        out_shapes=jax.ShapeDtypeStruct((n_pad, out2_pad), jnp.bfloat16),
        out_specs=pl.BlockSpec((tile, out2_pad), lambda i, k: (i, 0)),
        tile=tile)

    # Fused mu/logstd head: one aggregation pass, packed lane-dense f32 slab.
    head = _agg_call(
        _head_kernel, a_pad, hw_head, prep["b_head"],
        extra_args=[], extra_specs=[],
        out_shapes=jax.ShapeDtypeStruct((n_pad, out2_pad), jnp.float32),
        out_specs=pl.BlockSpec((tile, out2_pad), lambda i, k: (i, 0)),
        tile=tile)
    return head


def vgae_encoder(a_pad, x, prep, out_channels):
    head = _encoder_forward(a_pad, x, prep)
    n = x.shape[0]
    return head[:n, :out_channels], head[:n, out_channels:2 * out_channels]


# ----------------------------------------------------------------------------
# Graph / params / reference (JAX glue)
# ----------------------------------------------------------------------------
def build_normalized_adjacency(edge_index, num_nodes):
    """Dense A_hat = D^{-1/2} (A + I) D^{-1/2}, PyG gcn_norm semantics."""
    src, dst = edge_index[0], edge_index[1]
    a = jnp.zeros((num_nodes, num_nodes), jnp.float32).at[dst, src].add(1.0)
    a = a + jnp.eye(num_nodes, dtype=jnp.float32)  # add self-loops
    deg = a.sum(axis=1)
    dinv = 1.0 / jnp.sqrt(jnp.maximum(deg, 1e-12))
    return dinv[:, None] * a * dinv[None, :]


def init_params(key, in_channels, hidden_channels, out_channels):
    ks = jax.random.split(key, 8)

    def glorot(k, fan_in, fan_out):
        s = jnp.sqrt(6.0 / (fan_in + fan_out))
        return jax.random.uniform(k, (fan_in, fan_out), jnp.float32, -s, s)

    return {
        "w1": glorot(ks[0], in_channels, hidden_channels),
        "b1": 0.1 * jax.random.normal(ks[1], (1, hidden_channels), jnp.float32),
        "w2": glorot(ks[2], hidden_channels, hidden_channels),
        "b2": 0.1 * jax.random.normal(ks[3], (1, hidden_channels), jnp.float32),
        "w_mu": glorot(ks[4], hidden_channels, out_channels),
        "b_mu": 0.1 * jax.random.normal(ks[5], (1, out_channels), jnp.float32),
        "w_logstd": glorot(ks[6], hidden_channels, out_channels),
        "b_logstd": 0.1 * jax.random.normal(ks[7], (1, out_channels), jnp.float32),
        # Module inits this to 1.0; use a non-trivial value to exercise the path.
        "w_residual": jnp.full((1,), 0.75, jnp.float32),
    }


def reference_forward(a_hat, x, p):
    def gcn(h, w, b):
        return a_hat @ (h @ w) + b

    def elu(z):
        return jnp.where(z > 0, z, jnp.exp(z) - 1.0)

    x1 = elu(gcn(x, p["w1"], p["b1"]))
    x2 = elu(gcn(x1, p["w2"], p["b2"]))
    xc = x2 + p["w_residual"][0] * x1
    return gcn(xc, p["w_mu"], p["b_mu"]), gcn(xc, p["w_logstd"], p["b_logstd"])


# ----------------------------------------------------------------------------
# Test harness
# ----------------------------------------------------------------------------
def _run_case(num_nodes, in_c, hid_c, out_c, key):
    kx, kp = jax.random.split(key)
    x = jax.random.normal(kx, (num_nodes, in_c), jnp.float32)

    # Deterministic undirected ring graph: edge_index [2, 2N]
    idx = np.arange(num_nodes)
    src = np.concatenate([idx, (idx + 1) % num_nodes])
    dst = np.concatenate([(idx + 1) % num_nodes, idx])
    edge_index = jnp.asarray(np.stack([src, dst]), jnp.int32)

    a_hat = build_normalized_adjacency(edge_index, num_nodes)
    params = init_params(kp, in_c, hid_c, out_c)

    # One-time preprocessing (hoisted out of the forward path).
    n_pad, _ = _choose_tiling(num_nodes)
    a_pad = prepare_adjacency(a_hat, n_pad)
    prep = prepare_params(params, in_c, hid_c, out_c)

    mu, logstd = vgae_encoder(a_pad, x, prep, out_c)
    jax.block_until_ready((mu, logstd))

    mu_ref, ls_ref = reference_forward(a_hat, x, params)
    # bf16 MXU operands with f32 accumulation -> loosened tolerance vs f32 ref.
    np.testing.assert_allclose(np.asarray(mu), np.asarray(mu_ref),
                               rtol=4e-2, atol=4e-2)
    np.testing.assert_allclose(np.asarray(logstd), np.asarray(ls_ref),
                               rtol=4e-2, atol=4e-2)


if __name__ == "__main__":
    key = jax.random.PRNGKey(0)

    # Small case: single full-extent tile (n_pad = tile = 128).
    _run_case(16, 8, 32, 16, jax.random.fold_in(key, 0))

    # Larger case: exercises the multi-tile (row, reduction) grid, the
    # accumulator reset/finalize, and the fused residual/head epilogues
    # (n_pad = 1280, tile = 256, 5x5 grid).
    _run_case(1050, 16, 64, 8, jax.random.fold_in(key, 1))

    print("KERNEL_OK")
</pallas_src>

<mosaic_0001>
module attributes {stable_mosaic.version = 11 : i64} {
  func.func @_xw_kernel(%arg0: i32, %arg1: memref<128x128xbf16, #tpu.memory_space<vmem>>, %arg2: memref<128x128xbf16, #tpu.memory_space<vmem>>, %arg3: memref<128x128xbf16, #tpu.memory_space<vmem>>) attributes {dimension_semantics = [#tpu.dimension_semantics<parallel>], iteration_bounds = array<i64: 1>, scalar_prefetch = 0 : i64, scratch_operands = 0 : i64, tpu.core_type = #tpu.core_type<tc>, window_params = [{transform_indices = @transform_0, window_bounds = array<i64: 128, 128>}, {pipeline_mode = #tpu.pipeline_mode<synchronous>, transform_indices = @transform_1, window_bounds = array<i64: 128, 128>}, {transform_indices = @transform_2, window_bounds = array<i64: 128, 128>}]} {
    %c0 = arith.constant 0 : index
    %c0_0 = arith.constant 0 : index
    %0 = vector.load %arg1[%c0, %c0_0] : memref<128x128xbf16, #tpu.memory_space<vmem>>, vector<128x128xbf16>
    %c0_1 = arith.constant 0 : index
    %c0_2 = arith.constant 0 : index
    %1 = vector.load %arg2[%c0_1, %c0_2] : memref<128x128xbf16, #tpu.memory_space<vmem>>, vector<128x128xbf16>
    %cst = arith.constant dense<0.000000e+00> : vector<128x128xf32>
    %2 = tpu.matmul %0, %1, %cst {dimension_numbers = #tpu.dot_dimension_numbers<[1], [0], [0], [1], [0, 0, 1, 1], [], []>} : vector<128x128xbf16>, vector<128x128xbf16>, vector<128x128xf32> -> vector<128x128xf32>
    %3 = arith.truncf %2 : vector<128x128xf32> to vector<128x128xbf16>
    %c0_3 = arith.constant 0 : index
    %c0_4 = arith.constant 0 : index
    %4 = vector.load %arg3[%c0_3, %c0_4] : memref<128x128xbf16, #tpu.memory_space<vmem>>, vector<128x128xbf16>
    tpu.vector_store %arg3[%c0_3, %c0_4], %3 {strides = array<i32>} : memref<128x128xbf16, #tpu.memory_space<vmem>>, vector<128x128xbf16>,
    return
  }
  func.func @transform_0(%arg0: i32) -> (i32, i32) {
    %c0_i32 = arith.constant 0 : i32
    %c0_i32_0 = arith.constant 0 : i32
    return %arg0, %c0_i32 : i32, i32
  }
  func.func @transform_1(%arg0: i32) -> (i32, i32) {
    %c0_i32 = arith.constant 0 : i32
    %c0_i32_0 = arith.constant 0 : i32
    %c0_i32_1 = arith.constant 0 : i32
    return %c0_i32, %c0_i32_0 : i32, i32
  }
  func.func @transform_2(%arg0: i32) -> (i32, i32) {
    %c0_i32 = arith.constant 0 : i32
    %c0_i32_0 = arith.constant 0 : i32
    return %arg0, %c0_i32 : i32, i32
  }
}

module attributes {stable_mosaic.version = 11 : i64} {
  func.func @_head_kernel(%arg0: i32, %arg1: i32, %arg2: memref<128x128xbf16, #tpu.memory_space<vmem>>, %arg3: memref<128x128xbf16, #tpu.memory_space<vmem>>, %arg4: memref<1x128xf32, #tpu.memory_space<vmem>>, %arg5: memref<128x128xf32, #tpu.memory_space<vmem>>, %arg6: memref<128x128xf32, #tpu.memory_space<vmem>>) attributes {dimension_semantics = [#tpu.dimension_semantics<parallel>, #tpu.dimension_semantics<arbitrary>], iteration_bounds = array<i64: 1, 1>, scalar_prefetch = 0 : i64, scratch_operands = 1 : i64, tpu.core_type = #tpu.core_type<tc>, window_params = [{transform_indices = @transform_0, window_bounds = array<i64: 128, 128>}, {transform_indices = @transform_1, window_bounds = array<i64: 128, 128>}, {pipeline_mode = #tpu.pipeline_mode<synchronous>, transform_indices = @transform_2, window_bounds = array<i64: 1, 128>}, {transform_indices = @transform_3, window_bounds = array<i64: 128, 128>}]} {
    %c0_i32 = arith.constant 0 : i32
    %0 = arith.cmpi eq, %arg1, %c0_i32 : i32
    %1 = arith.extui %0 : i1 to i32
    %c0_i32_0 = arith.constant 0 : i32
    %2 = arith.cmpi ne, %1, %c0_i32_0 : i32
    scf.if %2 {
      %cst_10 = arith.constant 0.000000e+00 : f32
      %12 = vector.broadcast %cst_10 : f32 to vector<128x128xf32>
      %c0_11 = arith.constant 0 : index
      %c0_12 = arith.constant 0 : index
      %13 = vector.load %arg6[%c0_11, %c0_12] : memref<128x128xf32, #tpu.memory_space<vmem>>, vector<128x128xf32>
      tpu.vector_store %arg6[%c0_11, %c0_12], %12 {strides = array<i32>} : memref<128x128xf32, #tpu.memory_space<vmem>>, vector<128x128xf32>,
    } else {
    }
    %c0 = arith.constant 0 : index
    %c0_1 = arith.constant 0 : index
    %3 = vector.load %arg6[%c0, %c0_1] : memref<128x128xf32, #tpu.memory_space<vmem>>, vector<128x128xf32>
    %c0_2 = arith.constant 0 : index
    %c0_3 = arith.constant 0 : index
    %4 = vector.load %arg2[%c0_2, %c0_3] : memref<128x128xbf16, #tpu.memory_space<vmem>>, vector<128x128xbf16>
    %c0_4 = arith.constant 0 : index
    %c0_5 = arith.constant 0 : index
    %5 = vector.load %arg3[%c0_4, %c0_5] : memref<128x128xbf16, #tpu.memory_space<vmem>>, vector<128x128xbf16>
    %cst = arith.constant dense<0.000000e+00> : vector<128x128xf32>
    %6 = tpu.matmul %4, %5, %cst {dimension_numbers = #tpu.dot_dimension_numbers<[1], [0], [0], [1], [0, 0, 1, 1], [], []>} : vector<128x128xbf16>, vector<128x128xbf16>, vector<128x128xf32> -> vector<128x128xf32>
    %7 = arith.addf %3, %6 : vector<128x128xf32>
    %c0_6 = arith.constant 0 : index
    %c0_7 = arith.constant 0 : index
    %8 = vector.load %arg6[%c0_6, %c0_7] : memref<128x128xf32, #tpu.memory_space<vmem>>, vector<128x128xf32>
    tpu.vector_store %arg6[%c0_6, %c0_7], %7 {strides = array<i32>} : memref<128x128xf32, #tpu.memory_space<vmem>>, vector<128x128xf32>,
    %c0_i32_8 = arith.constant 0 : i32
    %9 = arith.cmpi eq, %arg1, %c0_i32_8 : i32
    %10 = arith.extui %9 : i1 to i32
    %c0_i32_9 = arith.constant 0 : i32
    %11 = arith.cmpi ne, %10, %c0_i32_9 : i32
    scf.if %11 {
      %c0_10 = arith.constant 0 : index
      %c0_11 = arith.constant 0 : index
      %12 = vector.load %arg6[%c0_10, %c0_11] : memref<128x128xf32, #tpu.memory_space<vmem>>, vector<128x128xf32>
      %c0_12 = arith.constant 0 : index
      %c0_13 = arith.constant 0 : index
      %13 = vector.load %arg4[%c0_12, %c0_13] : memref<1x128xf32, #tpu.memory_space<vmem>>, vector<1x128xf32>
      %14 = vector.broadcast %13 : vector<1x128xf32> to vector<128x128xf32>
      %15 = arith.addf %12, %14 : vector<128x128xf32>
      %c0_14 = arith.constant 0 : index
      %c0_15 = arith.constant 0 : index
      %16 = vector.load %arg5[%c0_14, %c0_15] : memref<128x128xf32, #tpu.memory_space<vmem>>, vector<128x128xf32>
      tpu.vector_store %arg5[%c0_14, %c0_15], %15 {strides = array<i32>} : memref<128x128xf32, #tpu.memory_space<vmem>>, vector<128x128xf32>,
    } else {
    }
    return
  }
  func.func @transform_0(%arg0: i32, %arg1: i32) -> (i32, i32) {
    %c0_i32 = arith.constant 0 : i32
    return %arg0, %arg1 : i32, i32
  }
  func.func @transform_1(%arg0: i32, %arg1: i32) -> (i32, i32) {
    %c0_i32 = arith.constant 0 : i32
    %c0_i32_0 = arith.constant 0 : i32
    return %arg1, %c0_i32 : i32, i32
  }
  func.func @transform_2(%arg0: i32, %arg1: i32) -> (i32, i32) {
    %c0_i32 = arith.constant 0 : i32
    %c0_i32_0 = arith.constant 0 : i32
    %c0_i32_1 = arith.constant 0 : i32
    return %c0_i32, %c0_i32_0 : i32, i32
  }
  func.func @transform_3(%arg0: i32, %arg1: i32) -> (i32, i32) {
    %c0_i32 = arith.constant 0 : i32
    %c0_i32_0 = arith.constant 0 : i32
    return %arg0, %c0_i32 : i32, i32
  }
}

module attributes {stable_mosaic.version = 11 : i64} {
  func.func @_conv2_kernel(%arg0: i32, %arg1: i32, %arg2: memref<128x128xbf16, #tpu.memory_space<vmem>>, %arg3: memref<128x128xbf16, #tpu.memory_space<vmem>>, %arg4: memref<1x128xf32, #tpu.memory_space<vmem>>, %arg5: memref<128x128xbf16, #tpu.memory_space<vmem>>, %arg6: memref<1xf32, #tpu.memory_space<smem>>, %arg7: memref<128x128xbf16, #tpu.memory_space<vmem>>, %arg8: memref<128x128xbf16, #tpu.memory_space<vmem>>, %arg9: memref<128x128xf32, #tpu.memory_space<vmem>>) attributes {dimension_semantics = [#tpu.dimension_semantics<parallel>, #tpu.dimension_semantics<arbitrary>], iteration_bounds = array<i64: 1, 1>, scalar_prefetch = 0 : i64, scratch_operands = 1 : i64, tpu.core_type = #tpu.core_type<tc>, window_params = [{transform_indices = @transform_0, window_bounds = array<i64: 128, 128>}, {transform_indices = @transform_1, window_bounds = array<i64: 128, 128>}, {pipeline_mode = #tpu.pipeline_mode<synchronous>, transform_indices = @transform_2, window_bounds = array<i64: 1, 128>}, {transform_indices = @transform_3, window_bounds = array<i64: 128, 128>}, {transform_indices = @transform_4, window_bounds = array<i64: 1>}, {pipeline_mode = #tpu.pipeline_mode<synchronous>, transform_indices = @transform_5, window_bounds = array<i64: 128, 128>}, {transform_indices = @transform_6, window_bounds = array<i64: 128, 128>}]} {
    %c0_i32 = arith.constant 0 : i32
    %0 = arith.cmpi eq, %arg1, %c0_i32 : i32
    %1 = arith.extui %0 : i1 to i32
    %c0_i32_0 = arith.constant 0 : i32
    %2 = arith.cmpi ne, %1, %c0_i32_0 : i32
    scf.if %2 {
      %cst_10 = arith.constant 0.000000e+00 : f32
      %12 = vector.broadcast %cst_10 : f32 to vector<128x128xf32>
      %c0_11 = arith.constant 0 : index
      %c0_12 = arith.constant 0 : index
      %13 = vector.load %arg9[%c0_11, %c0_12] : memref<128x128xf32, #tpu.memory_space<vmem>>, vector<128x128xf32>
      tpu.vector_store %arg9[%c0_11, %c0_12], %12 {strides = array<i32>} : memref<128x128xf32, #tpu.memory_space<vmem>>, vector<128x128xf32>,
    } else {
    }
    %c0 = arith.constant 0 : index
    %c0_1 = arith.constant 0 : index
    %3 = vector.load %arg9[%c0, %c0_1] : memref<128x128xf32, #tpu.memory_space<vmem>>, vector<128x128xf32>
    %c0_2 = arith.constant 0 : index
    %c0_3 = arith.constant 0 : index
    %4 = vector.load %arg2[%c0_2, %c0_3] : memref<128x128xbf16, #tpu.memory_space<vmem>>, vector<128x128xbf16>
    %c0_4 = arith.constant 0 : index
    %c0_5 = arith.constant 0 : index
    %5 = vector.load %arg3[%c0_4, %c0_5] : memref<128x128xbf16, #tpu.memory_space<vmem>>, vector<128x128xbf16>
    %cst = arith.constant dense<0.000000e+00> : vector<128x128xf32>
    %6 = tpu.matmul %4, %5, %cst {dimension_numbers = #tpu.dot_dimension_numbers<[1], [0], [0], [1], [0, 0, 1, 1], [], []>} : vector<128x128xbf16>, vector<128x128xbf16>, vector<128x128xf32> -> vector<128x128xf32>
    %7 = arith.addf %3, %6 : vector<128x128xf32>
    %c0_6 = arith.constant 0 : index
    %c0_7 = arith.constant 0 : index
    %8 = vector.load %arg9[%c0_6, %c0_7] : memref<128x128xf32, #tpu.memory_space<vmem>>, vector<128x128xf32>
    tpu.vector_store %arg9[%c0_6, %c0_7], %7 {strides = array<i32>} : memref<128x128xf32, #tpu.memory_space<vmem>>, vector<128x128xf32>,
    %c0_i32_8 = arith.constant 0 : i32
    %9 = arith.cmpi eq, %arg1, %c0_i32_8 : i32
    %10 = arith.extui %9 : i1 to i32
    %c0_i32_9 = arith.constant 0 : i32
    %11 = arith.cmpi ne, %10, %c0_i32_9 : i32
    scf.if %11 {
      %c0_10 = arith.constant 0 : index
      %c0_11 = arith.constant 0 : index
      %12 = vector.load %arg9[%c0_10, %c0_11] : memref<128x128xf32, #tpu.memory_space<vmem>>, vector<128x128xf32>
      %c0_12 = arith.constant 0 : index
      %c0_13 = arith.constant 0 : index
      %13 = vector.load %arg4[%c0_12, %c0_13] : memref<1x128xf32, #tpu.memory_space<vmem>>, vector<1x128xf32>
      %14 = vector.broadcast %13 : vector<1x128xf32> to vector<128x128xf32>
      %15 = arith.addf %12, %14 : vector<128x128xf32>
      %cst_14 = arith.constant 0.000000e+00 : f32
      %16 = vector.broadcast %cst_14 : f32 to vector<128x128xf32>
      %17 = arith.cmpf ogt, %15, %16 : vector<128x128xf32>
      %18 = math.exp %15 : vector<128x128xf32>
      %cst_15 = arith.constant 1.000000e+00 : f32
      %19 = vector.broadcast %cst_15 : f32 to vector<128x128xf32>
      %20 = arith.subf %18, %19 : vector<128x128xf32>
      %21 = arith.select %17, %15, %20 : vector<128x128xi1>, vector<128x128xf32>
      %c0_16 = arith.constant 0 : index
      %22 = memref.load %arg6[%c0_16] : memref<1xf32, #tpu.memory_space<smem>>
      %c0_17 = arith.constant 0 : index
      %c0_18 = arith.constant 0 : index
      %23 = vector.load %arg5[%c0_17, %c0_18] : memref<128x128xbf16, #tpu.memory_space<vmem>>, vector<128x128xbf16>
      %24 = arith.extf %23 : vector<128x128xbf16> to vector<128x128xf32>
      %25 = vector.broadcast %22 : f32 to vector<128x128xf32>
      %26 = arith.mulf %25, %24 : vector<128x128xf32>
      %27 = arith.addf %21, %26 : vector<128x128xf32>
      %28 = arith.truncf %27 : vector<128x128xf32> to vector<128x128xbf16>
      %c0_19 = arith.constant 0 : index
      %c0_20 = arith.constant 0 : index
      %29 = vector.load %arg7[%c0_19, %c0_20] : memref<128x128xbf16, #tpu.memory_space<vmem>>, vector<128x128xbf16>
      %cst_21 = arith.constant dense<0.000000e+00> : vector<128x128xf32>
      %30 = tpu.matmul %28, %29, %cst_21 {dimension_numbers = #tpu.dot_dimension_numbers<[1], [0], [0], [1], [0, 0, 1, 1], [], []>} : vector<128x128xbf16>, vector<128x128xbf16>, vector<128x128xf32> -> vector<128x128xf32>
      %31 = arith.truncf %30 : vector<128x128xf32> to vector<128x128xbf16>
      %c0_22 = arith.constant 0 : index
      %c0_23 = arith.constant 0 : index
      %32 = vector.load %arg8[%c0_22, %c0_23] : memref<128x128xbf16, #tpu.memory_space<vmem>>, vector<128x128xbf16>
      tpu.vector_store %arg8[%c0_22, %c0_23], %31 {strides = array<i32>} : memref<128x128xbf16, #tpu.memory_space<vmem>>, vector<128x128xbf16>,
    } else {
    }
    return
  }
  func.func @transform_0(%arg0: i32, %arg1: i32) -> (i32, i32) {
    %c0_i32 = arith.constant 0 : i32
    return %arg0, %arg1 : i32, i32
  }
  func.func @transform_1(%arg0: i32, %arg1: i32) -> (i32, i32) {
    %c0_i32 = arith.constant 0 : i32
    %c0_i32_0 = arith.constant 0 : i32
    return %arg1, %c0_i32 : i32, i32
  }
  func.func @transform_2(%arg0: i32, %arg1: i32) -> (i32, i32) {
    %c0_i32 = arith.constant 0 : i32
    %c0_i32_0 = arith.constant 0 : i32
    %c0_i32_1 = arith.constant 0 : i32
    return %c0_i32, %c0_i32_0 : i32, i32
  }
  func.func @transform_3(%arg0: i32, %arg1: i32) -> (i32, i32) {
    %c0_i32 = arith.constant 0 : i32
    %c0_i32_0 = arith.constant 0 : i32
    return %arg0, %c0_i32 : i32, i32
  }
  func.func @transform_4(%arg0: i32, %arg1: i32) -> i32 {
    %c0_i32 = arith.constant 0 : i32
    %c0_i32_0 = arith.constant 0 : i32
    return %c0_i32 : i32
  }
  func.func @transform_5(%arg0: i32, %arg1: i32) -> (i32, i32) {
    %c0_i32 = arith.constant 0 : i32
    %c0_i32_0 = arith.constant 0 : i32
    %c0_i32_1 = arith.constant 0 : i32
    return %c0_i32, %c0_i32_0 : i32, i32
  }
  func.func @transform_6(%arg0: i32, %arg1: i32) -> (i32, i32) {
    %c0_i32 = arith.constant 0 : i32
    %c0_i32_0 = arith.constant 0 : i32
    return %arg0, %c0_i32 : i32, i32
  }
}

module attributes {stable_mosaic.version = 11 : i64} {
  func.func @_conv1_kernel(%arg0: i32, %arg1: i32, %arg2: memref<128x128xbf16, #tpu.memory_space<vmem>>, %arg3: memref<128x128xbf16, #tpu.memory_space<vmem>>, %arg4: memref<1x128xf32, #tpu.memory_space<vmem>>, %arg5: memref<128x128xbf16, #tpu.memory_space<vmem>>, %arg6: memref<128x128xbf16, #tpu.memory_space<vmem>>, %arg7: memref<128x128xbf16, #tpu.memory_space<vmem>>, %arg8: memref<128x128xf32, #tpu.memory_space<vmem>>) attributes {dimension_semantics = [#tpu.dimension_semantics<parallel>, #tpu.dimension_semantics<arbitrary>], iteration_bounds = array<i64: 1, 1>, scalar_prefetch = 0 : i64, scratch_operands = 1 : i64, tpu.core_type = #tpu.core_type<tc>, window_params = [{transform_indices = @transform_0, window_bounds = array<i64: 128, 128>}, {transform_indices = @transform_1, window_bounds = array<i64: 128, 128>}, {pipeline_mode = #tpu.pipeline_mode<synchronous>, transform_indices = @transform_2, window_bounds = array<i64: 1, 128>}, {pipeline_mode = #tpu.pipeline_mode<synchronous>, transform_indices = @transform_3, window_bounds = array<i64: 128, 128>}, {transform_indices = @transform_4, window_bounds = array<i64: 128, 128>}, {transform_indices = @transform_5, window_bounds = array<i64: 128, 128>}]} {
    %c0_i32 = arith.constant 0 : i32
    %0 = arith.cmpi eq, %arg1, %c0_i32 : i32
    %1 = arith.extui %0 : i1 to i32
    %c0_i32_0 = arith.constant 0 : i32
    %2 = arith.cmpi ne, %1, %c0_i32_0 : i32
    scf.if %2 {
      %cst_10 = arith.constant 0.000000e+00 : f32
      %12 = vector.broadcast %cst_10 : f32 to vector<128x128xf32>
      %c0_11 = arith.constant 0 : index
      %c0_12 = arith.constant 0 : index
      %13 = vector.load %arg8[%c0_11, %c0_12] : memref<128x128xf32, #tpu.memory_space<vmem>>, vector<128x128xf32>
      tpu.vector_store %arg8[%c0_11, %c0_12], %12 {strides = array<i32>} : memref<128x128xf32, #tpu.memory_space<vmem>>, vector<128x128xf32>,
    } else {
    }
    %c0 = arith.constant 0 : index
    %c0_1 = arith.constant 0 : index
    %3 = vector.load %arg8[%c0, %c0_1] : memref<128x128xf32, #tpu.memory_space<vmem>>, vector<128x128xf32>
    %c0_2 = arith.constant 0 : index
    %c0_3 = arith.constant 0 : index
    %4 = vector.load %arg2[%c0_2, %c0_3] : memref<128x128xbf16, #tpu.memory_space<vmem>>, vector<128x128xbf16>
    %c0_4 = arith.constant 0 : index
    %c0_5 = arith.constant 0 : index
    %5 = vector.load %arg3[%c0_4, %c0_5] : memref<128x128xbf16, #tpu.memory_space<vmem>>, vector<128x128xbf16>
    %cst = arith.constant dense<0.000000e+00> : vector<128x128xf32>
    %6 = tpu.matmul %4, %5, %cst {dimension_numbers = #tpu.dot_dimension_numbers<[1], [0], [0], [1], [0, 0, 1, 1], [], []>} : vector<128x128xbf16>, vector<128x128xbf16>, vector<128x128xf32> -> vector<128x128xf32>
    %7 = arith.addf %3, %6 : vector<128x128xf32>
    %c0_6 = arith.constant 0 : index
    %c0_7 = arith.constant 0 : index
    %8 = vector.load %arg8[%c0_6, %c0_7] : memref<128x128xf32, #tpu.memory_space<vmem>>, vector<128x128xf32>
    tpu.vector_store %arg8[%c0_6, %c0_7], %7 {strides = array<i32>} : memref<128x128xf32, #tpu.memory_space<vmem>>, vector<128x128xf32>,
    %c0_i32_8 = arith.constant 0 : i32
    %9 = arith.cmpi eq, %arg1, %c0_i32_8 : i32
    %10 = arith.extui %9 : i1 to i32
    %c0_i32_9 = arith.constant 0 : i32
    %11 = arith.cmpi ne, %10, %c0_i32_9 : i32
    scf.if %11 {
      %c0_10 = arith.constant 0 : index
      %c0_11 = arith.constant 0 : index
      %12 = vector.load %arg8[%c0_10, %c0_11] : memref<128x128xf32, #tpu.memory_space<vmem>>, vector<128x128xf32>
      %c0_12 = arith.constant 0 : index
      %c0_13 = arith.constant 0 : index
      %13 = vector.load %arg4[%c0_12, %c0_13] : memref<1x128xf32, #tpu.memory_space<vmem>>, vector<1x128xf32>
      %14 = vector.broadcast %13 : vector<1x128xf32> to vector<128x128xf32>
      %15 = arith.addf %12, %14 : vector<128x128xf32>
      %cst_14 = arith.constant 0.000000e+00 : f32
      %16 = vector.broadcast %cst_14 : f32 to vector<128x128xf32>
      %17 = arith.cmpf ogt, %15, %16 : vector<128x128xf32>
      %18 = math.exp %15 : vector<128x128xf32>
      %cst_15 = arith.constant 1.000000e+00 : f32
      %19 = vector.broadcast %cst_15 : f32 to vector<128x128xf32>
      %20 = arith.subf %18, %19 : vector<128x128xf32>
      %21 = arith.select %17, %15, %20 : vector<128x128xi1>, vector<128x128xf32>
      %22 = arith.truncf %21 : vector<128x128xf32> to vector<128x128xbf16>
      %c0_16 = arith.constant 0 : index
      %c0_17 = arith.constant 0 : index
      %23 = vector.load %arg6[%c0_16, %c0_17] : memref<128x128xbf16, #tpu.memory_space<vmem>>, vector<128x128xbf16>
      tpu.vector_store %arg6[%c0_16, %c0_17], %22 {strides = array<i32>} : memref<128x128xbf16, #tpu.memory_space<vmem>>, vector<128x128xbf16>,
      %c0_18 = arith.constant 0 : index
      %c0_19 = arith.constant 0 : index
      %24 = vector.load %arg5[%c0_18, %c0_19] : memref<128x128xbf16, #tpu.memory_space<vmem>>, vector<128x128xbf16>
      %cst_20 = arith.constant dense<0.000000e+00> : vector<128x128xf32>
      %25 = tpu.matmul %22, %24, %cst_20 {dimension_numbers = #tpu.dot_dimension_numbers<[1], [0], [0], [1], [0, 0, 1, 1], [], []>} : vector<128x128xbf16>, vector<128x128xbf16>, vector<128x128xf32> -> vector<128x128xf32>
      %26 = arith.truncf %25 : vector<128x128xf32> to vector<128x128xbf16>
      %c0_21 = arith.constant 0 : index
      %c0_22 = arith.constant 0 : index
      %27 = vector.load %arg7[%c0_21, %c0_22] : memref<128x128xbf16, #tpu.memory_space<vmem>>, vector<128x128xbf16>
      tpu.vector_store %arg7[%c0_21, %c0_22], %26 {strides = array<i32>} : memref<128x128xbf16, #tpu.memory_space<vmem>>, vector<128x128xbf16>,
    } else {
    }
    return
  }
  func.func @transform_0(%arg0: i32, %arg1: i32) -> (i32, i32) {
    %c0_i32 = arith.constant 0 : i32
    return %arg0, %arg1 : i32, i32
  }
  func.func @transform_1(%arg0: i32, %arg1: i32) -> (i32, i32) {
    %c0_i32 = arith.constant 0 : i32
    %c0_i32_0 = arith.constant 0 : i32
    return %arg1, %c0_i32 : i32, i32
  }
  func.func @transform_2(%arg0: i32, %arg1: i32) -> (i32, i32) {
    %c0_i32 = arith.constant 0 : i32
    %c0_i32_0 = arith.constant 0 : i32
    %c0_i32_1 = arith.constant 0 : i32
    return %c0_i32, %c0_i32_0 : i32, i32
  }
  func.func @transform_3(%arg0: i32, %arg1: i32) -> (i32, i32) {
    %c0_i32 = arith.constant 0 : i32
    %c0_i32_0 = arith.constant 0 : i32
    %c0_i32_1 = arith.constant 0 : i32
    return %c0_i32, %c0_i32_0 : i32, i32
  }
  func.func @transform_4(%arg0: i32, %arg1: i32) -> (i32, i32) {
    %c0_i32 = arith.constant 0 : i32
    %c0_i32_0 = arith.constant 0 : i32
    return %arg0, %c0_i32 : i32, i32
  }
  func.func @transform_5(%arg0: i32, %arg1: i32) -> (i32, i32) {
    %c0_i32 = arith.constant 0 : i32
    %c0_i32_0 = arith.constant 0 : i32
    return %arg0, %c0_i32 : i32, i32
  }
}

</mosaic_0001>

<bundles_post_ra>
// kernel: _encoder_forward.4
= control target key start
LH: loop header
LB: loop body
LE: loop exit
PB: predicated region body
PF: predicated region fallthrough
CT: control target
= control target key end

     0   :  { %s583_s1 = inlined_call_operand.vmem [shape: bf16[128,128], index: 1, kind: input, shape index: {}]   ;;  %s584_s0 = inlined_call_operand.vmem [shape: bf16[128,128], index: 0, kind: input, shape index: {}]   ;;  %s585_s2 = inlined_call_operand.vmem [shape: bf16[128,128], index: 2, kind: output, shape index: {}]  }
   0x1   :  { %v480_v0 = vld [vmem:[%s583_s1] sm:$0xff]   ;;  %v481_v1 = vld [vmem:[%s583_s1 + $0x8] sm:$0xff]   ;;  %v482_v2 = vld [vmem:[%s583_s1 + $0x10] sm:$0xff]  }
   0x2   :  { %432 = vmatprep.subr.bf16.mxu0 %v480_v0  ;;  %464 = vmatprep.subr.bf16.mxu1 %v480_v0  ;;  %v483_v3 = vld [vmem:[%s583_s1 + $0x18] sm:$0xff]   ;;  %v488_v4 = vld [vmem:[%s584_s0] sm:$0xff]   ;;  %v485_v7 = vld [vmem:[%s583_s1 + $0x28] sm:$0xff]  }
   0x3   :  { %433 = vmatpush3.bf16.msra.mxu0 %v480_v0  ;;  %472 = vmatpush3.bf16.msra.mxu1 %v480_v0  ;;  %v489_v5 = vld [vmem:[%s584_s0 + $0x20] sm:$0xff]   ;;  %v486_v8 = vld [vmem:[%s583_s1 + $0x30] sm:$0xff]   ;;  %v487_v9 = vld [vmem:[%s583_s1 + $0x38] sm:$0xff]  }
   0x4   :  { %434 = vmatprep.subr.bf16.mxu0 %v481_v1  ;;  %465 = vmatprep.subr.bf16.mxu1 %v481_v1  ;;  %v484_v6 = vld [vmem:[%s583_s1 + $0x20] sm:$0xff]   ;;  %v490_v10 = vld [vmem:[%s584_s0 + $0x8] sm:$0xff]   ;;  %v492_v12 = vld [vmem:[%s584_s0 + $0x10] sm:$0xff]  }
   0x5   :  { %448 = vmatprep.mubr.bf16.mxu0 %v488_v4  ;;  %456 = vmatprep.mubr.bf16.mxu1 %v489_v5  ;;  %v491_v11 = vld [vmem:[%s584_s0 + $0x28] sm:$0xff]   ;;  %v493_v13 = vld [vmem:[%s584_s0 + $0x30] sm:$0xff]   ;;  %v494_v14 = vld [vmem:[%s584_s0 + $0x18] sm:$0xff]  }
   0x6   :  { %v495_v15 = vld [vmem:[%s584_s0 + $0x38] sm:$0xff]  }
   0x7   :  { %435 = vmatpush3.bf16.msra.mxu0 %v481_v1  ;;  %473 = vmatpush3.bf16.msra.mxu1 %v481_v1 }
   0x8   :  { %436 = vmatprep.subr.bf16.mxu0 %v482_v2  ;;  %466 = vmatprep.subr.bf16.mxu1 %v482_v2 }
   0xb   :  { %437 = vmatpush3.bf16.msra.mxu0 %v482_v2  ;;  %474 = vmatpush3.bf16.msra.mxu1 %v482_v2 }
   0xc   :  { %438 = vmatprep.subr.bf16.mxu0 %v483_v3  ;;  %467 = vmatprep.subr.bf16.mxu1 %v483_v3 }
   0xf   :  { %439 = vmatpush3.bf16.msra.mxu0 %v483_v3  ;;  %475 = vmatpush3.bf16.msra.mxu1 %v483_v3 }
  0x10   :  { %440 = vmatprep.subr.bf16.mxu0 %v484_v6  ;;  %468 = vmatprep.subr.bf16.mxu1 %v484_v6 }
  0x13   :  { %441 = vmatpush3.bf16.msra.mxu0 %v484_v6  ;;  %476 = vmatpush3.bf16.msra.mxu1 %v484_v6 }
  0x14   :  { %442 = vmatprep.subr.bf16.mxu0 %v485_v7  ;;  %469 = vmatprep.subr.bf16.mxu1 %v485_v7 }
  0x17   :  { %443 = vmatpush3.bf16.msra.mxu0 %v485_v7  ;;  %477 = vmatpush3.bf16.msra.mxu1 %v485_v7 }
  0x18   :  { %444 = vmatprep.subr.bf16.mxu0 %v486_v8  ;;  %470 = vmatprep.subr.bf16.mxu1 %v486_v8 }
  0x1b   :  { %445 = vmatpush3.bf16.msra.mxu0 %v486_v8  ;;  %478 = vmatpush3.bf16.msra.mxu1 %v486_v8 }
  0x1c   :  { %446 = vmatprep.subr.bf16.mxu0 %v487_v9  ;;  %471 = vmatprep.subr.bf16.mxu1 %v487_v9 }
  0x1f   :  { %447 = vmatpush3.bf16.msra.mxu0 %v487_v9  ;;  %479 = vmatpush3.bf16.msra.mxu1 %v487_v9 }
  0x22   :  { %449 = vmatmul.mubr.bf16.vlgmr.msra.gmra.mrb[0].mxu0 %v490_v10  ;;  %457 = vmatmul.mubr.bf16.vlgmr.msra.gmra.mrb[0].mxu1 %v491_v11 }
  0x23   :  { %452 = vmatprep.mubr.bf16.mxu0 %v492_v12  ;;  %460 = vmatprep.mubr.bf16.mxu1 %v493_v13 }
  0x2a   :  { %453 = vmatmul.mubr.bf16.gmra.mrb[4].mxu0 %v494_v14  ;;  %461 = vmatmul.mubr.bf16.gmra.mrb[4].mxu1 %v495_v15 }
  0xf5   :  { %v450_v16 = vpop.f32.mrb[0].mxu0  ;;  %v458_v17 = vpop.f32.mrb[0].mxu1 }
  0xf6   :  { %v174_v18 = vpop.f32.mrb[1].mxu0  ;;  %v206_v19 = vpop.f32.mrb[1].mxu1 }
  0xf7   :  { %v451_v20 = vpop.f32.mrb[2].mxu0  ;;  %v459_v21 = vpop.f32.mrb[2].mxu1 }
  0xf8   :  { %v377_v22 = vpack.c.bf16 %v451_v20, %v450_v16  ;;  %v397_v23 = vpack.c.bf16 %v459_v21, %v458_v17  ;;  %v177_v24 = vpop.f32.mrb[3].mxu0  ;;  %v209_v25 = vpop.f32.mrb[3].mxu1 }
  0xf9   :  { %v372_v26 = vpack.c.bf16 %v177_v24, %v174_v18  ;;  %v392_v27 = vpack.c.bf16 %v209_v25, %v206_v19 }
  0xfa   :  { %409 = vst [vmem:[%s585_s2 + $0x8] sm:$0xff] %v377_v22   ;;  %413 = vst [vmem:[%s585_s2 + $0x28] sm:$0xff] %v397_v23  }
  0xfb   :  { %373 = vst [vmem:[%s585_s2] sm:$0xff] %v372_v26   ;;  %412 = vst [vmem:[%s585_s2 + $0x20] sm:$0xff] %v392_v27  }
  0xfd   :  { %v454_v28 = vpop.f32.mrb[4].mxu0  ;;  %v462_v29 = vpop.f32.mrb[4].mxu1 }
  0xfe   :  { %v190_v30 = vpop.f32.mrb[5].mxu0  ;;  %v222_v31 = vpop.f32.mrb[5].mxu1 }
  0xff   :  { %v455_v32 = vpop.f32.mrb[6].mxu0  ;;  %v463_v33 = vpop.f32.mrb[6].mxu1 }
 0x100   :  { %v387_v34 = vpack.c.bf16 %v455_v32, %v454_v28  ;;  %v407_v35 = vpack.c.bf16 %v463_v33, %v462_v29  ;;  %v193_v36 = vpop.f32.mrb[7].mxu0  ;;  %v225_v37 = vpop.f32.mrb[7].mxu1 }
 0x101   :  { %v382_v38 = vpack.c.bf16 %v193_v36, %v190_v30  ;;  %v402_v39 = vpack.c.bf16 %v225_v37, %v222_v31 }
 0x102   :  { %411 = vst [vmem:[%s585_s2 + $0x18] sm:$0xff] %v387_v34   ;;  %415 = vst [vmem:[%s585_s2 + $0x38] sm:$0xff] %v407_v35  }
 0x103   :  { %410 = vst [vmem:[%s585_s2 + $0x10] sm:$0xff] %v382_v38   ;;  %414 = vst [vmem:[%s585_s2 + $0x30] sm:$0xff] %v402_v39  }

// kernel: _encoder_forward.7
= control target key start
LH: loop header
LB: loop body
LE: loop exit
PB: predicated region body
PF: predicated region fallthrough
CT: control target
= control target key end

     0   :  { %s593_s0 = inlined_call_operand.vmem [shape: bf16[128,128], index: 0, kind: input, shape index: {}]   ;;  %s594_s1 = inlined_call_operand.vmem [shape: bf16[128,128], index: 1, kind: input, shape index: {}]   ;;  %s595_s2 = inlined_call_operand.vmem [shape: f32[1,128], index: 2, kind: input, shape index: {}]   ;;  %s596_s3 = inlined_call_operand.hbm [shape: f32[128,128], index: 3, kind: output, shape index: {}]  }
   0x1   :  { %v467_v0 = vld [vmem:[%s594_s1] sm:$0xff]   ;;  %v468_v1 = vld [vmem:[%s594_s1 + $0x8] sm:$0xff]   ;;  %v469_v2 = vld [vmem:[%s594_s1 + $0x10] sm:$0xff]  }
   0x2   :  { %416 = vmatprep.subr.bf16.mxu0 %v467_v0  ;;  %448 = vmatprep.subr.bf16.mxu1 %v467_v0  ;;  %v470_v3 = vld [vmem:[%s594_s1 + $0x18] sm:$0xff]   ;;  %v475_v4 = vld [vmem:[%s593_s0] sm:$0xff]   ;;  %v472_v7 = vld [vmem:[%s594_s1 + $0x28] sm:$0xff]  }
   0x3   :  { %417 = vmatpush3.bf16.msra.mxu0 %v467_v0  ;;  %456 = vmatpush3.bf16.msra.mxu1 %v467_v0  ;;  %v476_v5 = vld [vmem:[%s593_s0 + $0x20] sm:$0xff]  }
   0x4   :  { %418 = vmatprep.subr.bf16.mxu0 %v468_v1  ;;  %449 = vmatprep.subr.bf16.mxu1 %v468_v1  ;;  %v471_v6 = vld [vmem:[%s594_s1 + $0x20] sm:$0xff]  }
   0x5   :  { %432 = vmatprep.mubr.bf16.mxu0 %v475_v4  ;;  %440 = vmatprep.mubr.bf16.mxu1 %v476_v5 }
   0x7   :  { %419 = vmatpush3.bf16.msra.mxu0 %v468_v1  ;;  %457 = vmatpush3.bf16.msra.mxu1 %v468_v1 }
   0x8   :  { %420 = vmatprep.subr.bf16.mxu0 %v469_v2  ;;  %450 = vmatprep.subr.bf16.mxu1 %v469_v2 }
   0xb   :  { %421 = vmatpush3.bf16.msra.mxu0 %v469_v2  ;;  %458 = vmatpush3.bf16.msra.mxu1 %v469_v2 }
   0xc   :  { %422 = vmatprep.subr.bf16.mxu0 %v470_v3  ;;  %451 = vmatprep.subr.bf16.mxu1 %v470_v3 }
   0xf   :  { %423 = vmatpush3.bf16.msra.mxu0 %v470_v3  ;;  %459 = vmatpush3.bf16.msra.mxu1 %v470_v3 }
  0x10   :  { %424 = vmatprep.subr.bf16.mxu0 %v471_v6  ;;  %452 = vmatprep.subr.bf16.mxu1 %v471_v6 }
  0x11   :  { %8 = vsyncpa [#allocation4], 0  ;;  %v473_v8 = vld [vmem:[%s594_s1 + $0x30] sm:$0xff]   ;;  %v474_v9 = vld [vmem:[%s594_s1 + $0x38] sm:$0xff]  }
  0x12   :  { %v477_v10 = vld [vmem:[%s593_s0 + $0x8] sm:$0xff]   ;;  %v479_v12 = vld [vmem:[%s593_s0 + $0x10] sm:$0xff]   ;;  %v481_v14 = vld [vmem:[%s593_s0 + $0x18] sm:$0xff]  }
  0x13   :  { %425 = vmatpush3.bf16.msra.mxu0 %v471_v6  ;;  %460 = vmatpush3.bf16.msra.mxu1 %v471_v6  ;;  %v478_v11 = vld [vmem:[%s593_s0 + $0x28] sm:$0xff]   ;;  %v480_v13 = vld [vmem:[%s593_s0 + $0x30] sm:$0xff]   ;;  %v482_v15 = vld [vmem:[%s593_s0 + $0x38] sm:$0xff]   ;;  %s507_s0 = smov [#allocation3]  }
  0x14   :  { %426 = vmatprep.subr.bf16.mxu0 %v472_v7  ;;  %453 = vmatprep.subr.bf16.mxu1 %v472_v7  ;;  %v399_v16 = vld [vmem:[%s595_s2] ss:$0 sm:$0xff]  ;;  %s372_s2 = sshll.u32 %s507_s0, 4  ;;  %s373_s2 = int_to_ptr.vmem [resolvable:$true] %s372_s2 }
  0x15   :  { %s483_s18 = scalar_lea.vmem %s373_s2, 2048  ;;  %p488_p1 = scmp.lt.s32.totalorder %s373_s2, %s373_s2 }
  0x16   :  { %p484_p0 = scmp.ne.s32.totalorder %s373_s2, %s483_s18  ;;  %p489_p2 = scmp.lt.s32.totalorder %s483_s18, %s483_s18 }
  0x17   :  { %427 = vmatpush3.bf16.msra.mxu0 %v472_v7  ;;  %461 = vmatpush3.bf16.msra.mxu1 %v472_v7 }
  0x18   :  { %428 = vmatprep.subr.bf16.mxu0 %v473_v8  ;;  %454 = vmatprep.subr.bf16.mxu1 %v473_v8  ;;  %p490_p3 = por %p489_p2, %p488_p1 }
  0x1a   :  { %p491_p4 = pnand %p490_p3, %p484_p0 }
  0x1b   :  { %429 = vmatpush3.bf16.msra.mxu0 %v473_v8  ;;  %462 = vmatpush3.bf16.msra.mxu1 %v473_v8 }
  0x1c   :  { %430 = vmatprep.subr.bf16.mxu0 %v474_v9  ;;  %455 = vmatprep.subr.bf16.mxu1 %v474_v9 }
  0x1f   :  { %431 = vmatpush3.bf16.msra.mxu0 %v474_v9  ;;  %463 = vmatpush3.bf16.msra.mxu1 %v474_v9 }
  0x22   :  { %433 = vmatmul.mubr.bf16.vlgmr.msra.gmra.mrb[0].mxu0 %v477_v10  ;;  %441 = vmatmul.mubr.bf16.vlgmr.msra.gmra.mrb[0].mxu1 %v478_v11 }
  0x23   :  { %436 = vmatprep.mubr.bf16.mxu0 %v479_v12  ;;  %444 = vmatprep.mubr.bf16.mxu1 %v480_v13 }
  0x2a   :  { %437 = vmatmul.mubr.bf16.gmra.mrb[4].mxu0 %v481_v14  ;;  %445 = vmatmul.mubr.bf16.gmra.mrb[4].mxu1 %v482_v15 }
  0xf5   :  { %v434_v17 = vpop.f32.mrb[0].mxu0  ;;  %v442_v18 = vpop.f32.mrb[0].mxu1 }
  0xf6   :  { %v337_v19 = vadd.f32 %v434_v17, %v399_v16  ;;  %v345_v20 = vadd.f32 %v442_v18, %v399_v16  ;;  %v214_v21 = vpop.f32.mrb[1].mxu0  ;;  %v246_v22 = vpop.f32.mrb[1].mxu1 }
  0xf7   :  { %v335_v23 = vadd.f32 %v399_v16, %v214_v21  ;;  %v343_v24 = vadd.f32 %v399_v16, %v246_v22  ;;  %v435_v25 = vpop.f32.mrb[2].mxu0  ;;  %v443_v26 = vpop.f32.mrb[2].mxu1 }
  0xf8   :  { %353 = vst [vmem:[#allocation3 + $0x10] sm:$0xff] %v337_v19  ;;  %361 = vst [vmem:[#allocation3 + $0x50] sm:$0xff] %v345_v20  ;;  %v338_v27 = vadd.f32 %v435_v25, %v399_v16  ;;  %v346_v28 = vadd.f32 %v443_v26, %v399_v16  ;;  %v217_v29 = vpop.f32.mrb[3].mxu0  ;;  %v249_v30 = vpop.f32.mrb[3].mxu1 }
  0xf9   :  { %351 = vst [vmem:[#allocation3] sm:$0xff] %v335_v23  ;;  %359 = vst [vmem:[#allocation3 + $0x40] sm:$0xff] %v343_v24  ;;  %v336_v31 = vadd.f32 %v399_v16, %v217_v29  ;;  %v344_v32 = vadd.f32 %v399_v16, %v249_v30 }
  0xfa   :  { %354 = vst [vmem:[#allocation3 + $0x18] sm:$0xff] %v338_v27  ;;  %362 = vst [vmem:[#allocation3 + $0x58] sm:$0xff] %v346_v28 }
  0xfb   :  { %352 = vst [vmem:[#allocation3 + $0x8] sm:$0xff] %v336_v31  ;;  %360 = vst [vmem:[#allocation3 + $0x48] sm:$0xff] %v344_v32 }
  0xfd   :  { %v438_v33 = vpop.f32.mrb[4].mxu0  ;;  %v446_v34 = vpop.f32.mrb[4].mxu1 }
  0xfe   :  { %v341_v35 = vadd.f32 %v438_v33, %v399_v16  ;;  %v349_v36 = vadd.f32 %v446_v34, %v399_v16  ;;  %v230_v37 = vpop.f32.mrb[5].mxu0  ;;  %v262_v38 = vpop.f32.mrb[5].mxu1 }
  0xff   :  { %v339_v39 = vadd.f32 %v399_v16, %v230_v37  ;;  %v347_v40 = vadd.f32 %v399_v16, %v262_v38  ;;  %v439_v41 = vpop.f32.mrb[6].mxu0  ;;  %v447_v42 = vpop.f32.mrb[6].mxu1 }
 0x100   :  { %357 = vst [vmem:[#allocation3 + $0x30] sm:$0xff] %v341_v35  ;;  %365 = vst [vmem:[#allocation3 + $0x70] sm:$0xff] %v349_v36  ;;  %v342_v43 = vadd.f32 %v439_v41, %v399_v16  ;;  %v350_v44 = vadd.f32 %v447_v42, %v399_v16  ;;  %v233_v45 = vpop.f32.mrb[7].mxu0  ;;  %v265_v46 = vpop.f32.mrb[7].mxu1 }
 0x101   :  { %355 = vst [vmem:[#allocation3 + $0x20] sm:$0xff] %v339_v39  ;;  %363 = vst [vmem:[#allocation3 + $0x60] sm:$0xff] %v347_v40  ;;  %v340_v47 = vadd.f32 %v399_v16, %v233_v45  ;;  %v348_v48 = vadd.f32 %v399_v16, %v265_v46 }
 0x102   :  { %358 = vst [vmem:[#allocation3 + $0x38] sm:$0xff] %v342_v43  ;;  %366 = vst [vmem:[#allocation3 + $0x78] sm:$0xff] %v350_v44 }
 0x103   :  { %356 = vst [vmem:[#allocation3 + $0x28] sm:$0xff] %v340_v47  ;;  %364 = vst [vmem:[#allocation3 + $0x68] sm:$0xff] %v348_v48 }
 0x104   :  { %494 = shalt.err (!%p491_p4)
}
 0x105   :  { %s495_s21 = scalar_lea.hbm %s596_s3, 2048 }
 0x106   :  { %p496_p5 = scmp.ne.s32.totalorder %s596_s3, %s495_s21  ;;  %p499_p6 = scmp.lt.u32.totalorder %s495_s21, %s596_s3 }
 0x108   :  { %p501_p7 = pnand %p499_p6, %p496_p5 }
 0x10a   :  { %504 = shalt.err (!%p501_p7)
}
 0x10b   :  { %s508_s26 = smov 128   ;;  %s509_s27 = smov 8  }
 0x10c   :  { %378 = dma.vmem_to_hbm [thread:$0]  %s373_s2, 2048, %s596_s3, [#allocation4], %s508_s26, %s508_s26, %s509_s27  }
 0x10d   :  { %505 = dma.done.wait [#allocation4], 2048  }
 0x10e   :  { %506 = vsyncadd [#allocation4], 4294965248 }
 0x10f   :  { %382 = vsyncpa [#allocation4], 1 }

// kernel: _encoder_forward.5
= control target key start
LH: loop header
LB: loop body
LE: loop exit
PB: predicated region body
PF: predicated region fallthrough
CT: control target
= control target key end

     0   :  { %s1345_s1 = inlined_call_operand.vmem [shape: bf16[128,128], index: 1, kind: input, shape index: {}]   ;;  %s1346_s0 = inlined_call_operand.vmem [shape: bf16[128,128], index: 0, kind: input, shape index: {}]   ;;  %s1347_s3 = inlined_call_operand.vmem [shape: bf16[128,128], index: 3, kind: input, shape index: {}]   ;;  %s1348_s2 = inlined_call_operand.vmem [shape: f32[1,128], index: 2, kind: input, shape index: {}]   ;;  %s1349_s4 = inlined_call_operand.vmem [shape: bf16[128,128], index: 4, kind: output, shape index: {0}]   ;;  %s1350_s5 = inlined_call_operand.vmem [shape: bf16[128,128], index: 5, kind: output, shape index: {1}]  }
   0x1   :  { %v1059_v0 = vld [vmem:[%s1345_s1] sm:$0xff]   ;;  %v1060_v1 = vld [vmem:[%s1345_s1 + $0x8] sm:$0xff]   ;;  %v1061_v2 = vld [vmem:[%s1345_s1 + $0x10] sm:$0xff]  }
   0x2   :  { %995 = vmatprep.subr.bf16.mxu0 %v1059_v0  ;;  %v1062_v3 = vld [vmem:[%s1345_s1 + $0x18] sm:$0xff]   ;;  %v1067_v4 = vld [vmem:[%s1346_s0] sm:$0xff]   ;;  %v1064_v6 = vld [vmem:[%s1345_s1 + $0x28] sm:$0xff]  }
   0x3   :  { %996 = vmatpush3.bf16.msra.mxu0 %v1059_v0  ;;  %1011 = vmatprep.mubr.bf16.mxu0 %v1067_v4  ;;  %v1063_v5 = vld [vmem:[%s1345_s1 + $0x20] sm:$0xff]   ;;  %v1076_v8 = vld [vmem:[%s1347_s3 + $0x8] sm:$0xff]   ;;  %v1065_v9 = vld [vmem:[%s1345_s1 + $0x30] sm:$0xff]  }
   0x4   :  { %997 = vmatprep.subr.bf16.mxu0 %v1060_v1  ;;  %v1075_v7 = vld [vmem:[%s1347_s3] sm:$0xff]   ;;  %v1066_v10 = vld [vmem:[%s1345_s1 + $0x38] sm:$0xff]   ;;  %v1068_v11 = vld [vmem:[%s1346_s0 + $0x8] sm:$0xff]  }
   0x5   :  { %1027 = vmatprep.subr.bf16.mxu1 %v1075_v7  ;;  %v1069_v12 = vld [vmem:[%s1346_s0 + $0x10] sm:$0xff]   ;;  %v1070_v13 = vld [vmem:[%s1346_s0 + $0x18] sm:$0xff]   ;;  %v1071_v14 = vld [vmem:[%s1346_s0 + $0x20] sm:$0xff]  }
   0x6   :  { %1028 = vmatpush3.bf16.msra.mxu1 %v1075_v7  ;;  %v1072_v15 = vld [vmem:[%s1346_s0 + $0x28] sm:$0xff]   ;;  %v1073_v16 = vld [vmem:[%s1346_s0 + $0x30] sm:$0xff]   ;;  %v1074_v17 = vld [vmem:[%s1346_s0 + $0x38] sm:$0xff]  }
   0x7   :  { %998 = vmatpush3.bf16.msra.mxu0 %v1060_v1  ;;  %1029 = vmatprep.subr.bf16.mxu1 %v1076_v8  ;;  %v1077_v18 = vld [vmem:[%s1347_s3 + $0x10] sm:$0xff]   ;;  %v1078_v19 = vld [vmem:[%s1347_s3 + $0x18] sm:$0xff]   ;;  %v1079_v20 = vld [vmem:[%s1347_s3 + $0x20] sm:$0xff]  }
   0x8   :  { %999 = vmatprep.subr.bf16.mxu0 %v1061_v2  ;;  %v1080_v21 = vld [vmem:[%s1347_s3 + $0x28] sm:$0xff]   ;;  %v1081_v22 = vld [vmem:[%s1347_s3 + $0x30] sm:$0xff]   ;;  %v1082_v23 = vld [vmem:[%s1347_s3 + $0x38] sm:$0xff]  }
   0x9   :  { %v1220_v24 = vld [vmem:[%s1348_s2] ss:$0 sm:$0xff] }
   0xa   :  { %1030 = vmatpush3.bf16.msra.mxu1 %v1076_v8 }
   0xb   :  { %1000 = vmatpush3.bf16.msra.mxu0 %v1061_v2  ;;  %1031 = vmatprep.subr.bf16.mxu1 %v1077_v18 }
   0xc   :  { %1001 = vmatprep.subr.bf16.mxu0 %v1062_v3 }
   0xe   :  { %1032 = vmatpush3.bf16.msra.mxu1 %v1077_v18 }
   0xf   :  { %1002 = vmatpush3.bf16.msra.mxu0 %v1062_v3  ;;  %1033 = vmatprep.subr.bf16.mxu1 %v1078_v19 }
  0x10   :  { %1003 = vmatprep.subr.bf16.mxu0 %v1063_v5 }
  0x12   :  { %1034 = vmatpush3.bf16.msra.mxu1 %v1078_v19 }
  0x13   :  { %1004 = vmatpush3.bf16.msra.mxu0 %v1063_v5  ;;  %1035 = vmatprep.subr.bf16.mxu1 %v1079_v20 }
  0x14   :  { %1005 = vmatprep.subr.bf16.mxu0 %v1064_v6 }
  0x16   :  { %1036 = vmatpush3.bf16.msra.mxu1 %v1079_v20 }
  0x17   :  { %1006 = vmatpush3.bf16.msra.mxu0 %v1064_v6  ;;  %1037 = vmatprep.subr.bf16.mxu1 %v1080_v21 }
  0x18   :  { %1007 = vmatprep.subr.bf16.mxu0 %v1065_v9 }
  0x1a   :  { %1038 = vmatpush3.bf16.msra.mxu1 %v1080_v21 }
  0x1b   :  { %1008 = vmatpush3.bf16.msra.mxu0 %v1065_v9  ;;  %1039 = vmatprep.subr.bf16.mxu1 %v1081_v22 }
  0x1c   :  { %1009 = vmatprep.subr.bf16.mxu0 %v1066_v10 }
  0x1e   :  { %1040 = vmatpush3.bf16.msra.mxu1 %v1081_v22 }
  0x1f   :  { %1010 = vmatpush3.bf16.msra.mxu0 %v1066_v10  ;;  %1041 = vmatprep.subr.bf16.mxu1 %v1082_v23 }
  0x22   :  { %1012 = vmatmul.mubr.bf16.vlgmr.msra.gmra.mrb[0].mxu0 %v1068_v11  ;;  %1042 = vmatpush3.bf16.msra.mxu1 %v1082_v23 }
  0x23   :  { %1015 = vmatprep.mubr.bf16.mxu0 %v1069_v12 }
  0x2a   :  { %1016 = vmatmul.mubr.bf16.gmra.mrb[4].mxu0 %v1070_v13 }
  0x2b   :  { %1019 = vmatprep.mubr.bf16.mxu0 %v1071_v14 }
  0x32   :  { %1020 = vmatmul.mubr.bf16.gmra.mrb[8].mxu0 %v1072_v15 }
  0x33   :  { %1023 = vmatprep.mubr.bf16.mxu0 %v1073_v16 }
  0x3a   :  { %1024 = vmatmul.mubr.bf16.gmra.mrb[12].mxu0 %v1074_v17 }
  0xf5   :  { %v1013_v25 = vpop.f32.mrb[0].mxu0 }
  0xf6   :  { %v1223_v26 = vadd.f32 %v1013_v25, %v1220_v24  ;;  %v218_v27 = vpop.f32.mrb[1].mxu0 }
  0xf7   :  { %v339_v28 = vadd.f32 %v1220_v24, %v218_v27  ;;  %v1014_v29 = vpop.f32.mrb[2].mxu0 }
  0xf8   :  { %v375_v30 = vmul.f32 1.442695, %v1223_v26  ;;  %v342_v31 = vadd.f32 %v1014_v29, %v1220_v24  ;;  %v221_v32 = vpop.f32.mrb[3].mxu0  ;;  %vm357_vm0 = vcmp.gt.f32.partialorder %v1223_v26, 0.0 }
  0xf9   :  { %v371_v33 = vmul.f32 1.442695, %v339_v28  ;;  %v340_v34 = vadd.f32 %v1220_v24, %v221_v32  ;;  %vm355_vm1 = vcmp.gt.f32.partialorder %v339_v28, 0.0 }
  0xfa   :  { %1083 = vpow2.f32 %v375_v30  ;;  %v377_v35 = vmul.f32 1.442695, %v342_v31  ;;  %vm358_vm3 = vcmp.gt.f32.partialorder %v342_v31, 0.0 }
  0xfb   :  { %1085 = vpow2.f32 %v371_v33  ;;  %v373_v36 = vmul.f32 1.442695, %v340_v34  ;;  %vm356_vm2 = vcmp.gt.f32.partialorder %v340_v34, 0.0 }
  0xfc   :  { %1087 = vpow2.f32 %v377_v35 }
  0xfd   :  { %1089 = vpow2.f32 %v373_v36  ;;  %v1017_v37 = vpop.f32.mrb[4].mxu0 }
  0xfe   :  { %v1230_v38 = vadd.f32 %v1017_v37, %v1220_v24  ;;  %v234_v39 = vpop.f32.mrb[5].mxu0 }
  0xff   :  { %v1233_v40 = vadd.f32 %v1220_v24, %v234_v39  ;;  %v1018_v41 = vpop.f32.mrb[6].mxu0 }
 0x100   :  { %v383_v42 = vmul.f32 1.442695, %v1230_v38  ;;  %v1237_v43 = vadd.f32 %v1018_v41, %v1220_v24  ;;  %v237_v44 = vpop.f32.mrb[7].mxu0  ;;  %vm361_vm4 = vcmp.gt.f32.partialorder %v1230_v38, 0.0 }
 0x101   :  { %v379_v45 = vmul.f32 1.442695, %v1233_v40  ;;  %v1241_v46 = vadd.f32 %v1220_v24, %v237_v44  ;;  %vm359_vm5 = vcmp.gt.f32.partialorder %v1233_v40, 0.0 }
 0x102   :  { %1091 = vpow2.f32 %v383_v42  ;;  %v385_v47 = vmul.f32 1.442695, %v1237_v43  ;;  %vm362_vm7 = vcmp.gt.f32.partialorder %v1237_v43, 0.0 }
 0x103   :  { %1093 = vpow2.f32 %v379_v45  ;;  %v381_v48 = vmul.f32 1.442695, %v1241_v46  ;;  %vm360_vm6 = vcmp.gt.f32.partialorder %v1241_v46, 0.0 }
 0x104   :  { %v1084_v49 = vpop.eup %1083  ;;  %1095 = vpow2.f32 %v385_v47 }
 0x105   :  { %v1086_v50 = vpop.eup %1085  ;;  %1097 = vpow2.f32 %v381_v48  ;;  %v1021_v51 = vpop.f32.mrb[8].mxu0  ;;  %v783_v57 = vadd.f32 -1.0, %v1084_v49 }
 0x106   :  { %v1088_v52 = vpop.eup %1087  ;;  %v1246_v53 = vadd.f32 %v1021_v51, %v1220_v24  ;;  %v250_v54 = vpop.f32.mrb[9].mxu0  ;;  %v781_v55 = vadd.f32 -1.0, %v1086_v50 }
 0x107   :  { %v1090_v56 = vpop.eup %1089  ;;  %v1250_v58 = vadd.f32 %v1220_v24, %v250_v54  ;;  %v1022_v59 = vpop.f32.mrb[10].mxu0  ;;  %v784_v60 = vadd.f32 -1.0, %v1088_v52  ;;  %v421_v9 = vsel %vm357_vm0, %v1223_v26, %v783_v57 }
 0x108   :  { %v391_v61 = vmul.f32 1.442695, %v1246_v53  ;;  %v1254_v62 = vadd.f32 %v1022_v59, %v1220_v24  ;;  %v253_v63 = vpop.f32.mrb[11].mxu0  ;;  %v782_v0 = vadd.f32 -1.0, %v1090_v56  ;;  %v419_v4 = vsel %vm355_vm1, %v339_v28, %v781_v55 }
 0x109   :  { %v387_v1 = vmul.f32 1.442695, %v1250_v58  ;;  %v1258_v2 = vadd.f32 %v1220_v24, %v253_v63  ;;  %v422_v10 = vsel %vm358_vm3, %v342_v31, %v784_v60  ;;  %vm365_vm8 = vcmp.gt.f32.partialorder %v1246_v53, 0.0 }
 0x10a   :  { %1099 = vpow2.f32 %v391_v61  ;;  %v393_v3 = vmul.f32 1.442695, %v1254_v62  ;;  %v420_v5 = vsel %vm356_vm2, %v340_v34, %v782_v0  ;;  %v436_v13 = vpack.c.bf16 %v422_v10, %v421_v9 }
 0x10b   :  { %1101 = vpow2.f32 %v387_v1  ;;  %v389_v6 = vmul.f32 1.442695, %v1258_v2  ;;  %v435_v7 = vpack.c.bf16 %v420_v5, %v419_v4  ;;  %vm366_vm9 = vcmp.gt.f32.partialorder %v1254_v62, 0.0 }
 0x10c   :  { %v1092_v8 = vpop.eup %1091  ;;  %1103 = vpow2.f32 %v393_v3  ;;  %949 = vst [vmem:[%s1349_s4 + $0x8] sm:$0xff] %v436_v13   ;;  %vm363_vm10 = vcmp.gt.f32.partialorder %v1250_v58, 0.0  ;;  %vm364_vm11 = vcmp.gt.f32.partialorder %v1258_v2, 0.0 }
 0x10d   :  { %v1094_v11 = vpop.eup %1093  ;;  %1105 = vpow2.f32 %v389_v6  ;;  %v1025_v12 = vpop.f32.mrb[12].mxu0  ;;  %873 = vst [vmem:[%s1349_s4] sm:$0xff] %v435_v7   ;;  %1043 = vmatprep.mubr.bf16.mxu1 %v435_v7  ;;  %v787_v19 = vadd.f32 -1.0, %v1092_v8 }
 0x10e   :  { %v1096_v14 = vpop.eup %1095  ;;  %v785_v15 = vadd.f32 -1.0, %v1094_v11  ;;  %v1269_v16 = vadd.f32 %v1025_v12, %v1220_v24  ;;  %v266_v17 = vpop.f32.mrb[13].mxu0  ;;  %1044 = vmatmul.mubr.bf16.vlgmr.msra.gmra.mrb[0].mxu1 %v436_v13 }
 0x10f   :  { %v1098_v18 = vpop.eup %1097  ;;  %v1273_v20 = vadd.f32 %v1220_v24, %v266_v17  ;;  %v1026_v21 = vpop.f32.mrb[14].mxu0  ;;  %v788_v22 = vadd.f32 -1.0, %v1096_v14  ;;  %v425_v36 = vsel %vm361_vm4, %v1230_v38, %v787_v19 }
 0x110   :  { %v786_v23 = vadd.f32 -1.0, %v1098_v18  ;;  %v399_v25 = vmul.f32 1.442695, %v1269_v16  ;;  %v354_v26 = vadd.f32 %v1026_v21, %v1220_v24  ;;  %v269_v27 = vpop.f32.mrb[15].mxu0  ;;  %v423_v31 = vsel %vm359_vm5, %v1233_v40, %v785_v15 }
 0x111   :  { %v395_v28 = vmul.f32 1.442695, %v1273_v20  ;;  %v352_v29 = vadd.f32 %v1220_v24, %v269_v27  ;;  %v426_v37 = vsel %vm362_vm7, %v1237_v43, %v788_v22  ;;  %vm369_vm12 = vcmp.gt.f32.partialorder %v1269_v16, 0.0 }
 0x112   :  { %1107 = vpow2.f32 %v399_v25  ;;  %v401_v30 = vmul.f32 1.442695, %v354_v26  ;;  %v424_v32 = vsel %vm360_vm6, %v1241_v46, %v786_v23  ;;  %v438_v40 = vpack.c.bf16 %v426_v37, %v425_v36 }
 0x113   :  { %1109 = vpow2.f32 %v395_v28  ;;  %v397_v33 = vmul.f32 1.442695, %v352_v29  ;;  %v437_v34 = vpack.c.bf16 %v424_v32, %v423_v31  ;;  %vm370_vm13 = vcmp.gt.f32.partialorder %v354_v26, 0.0 }
 0x114   :  { %v1100_v35 = vpop.eup %1099  ;;  %1111 = vpow2.f32 %v401_v30  ;;  %951 = vst [vmem:[%s1349_s4 + $0x18] sm:$0xff] %v438_v40   ;;  %vm367_vm14 = vcmp.gt.f32.partialorder %v1273_v20, 0.0  ;;  %vm368_vm15 = vcmp.gt.f32.partialorder %v352_v29, 0.0 }
 0x115   :  { %v1102_v24 = vpop.eup %1101  ;;  %v791_v39 = vadd.f32 -1.0, %v1100_v35  ;;  %1113 = vpow2.f32 %v397_v33  ;;  %950 = vst [vmem:[%s1349_s4 + $0x10] sm:$0xff] %v437_v34   ;;  %1047 = vmatprep.mubr.bf16.mxu1 %v437_v34 }
 0x116   :  { %v1104_v41 = vpop.eup %1103  ;;  %v789_v42 = vadd.f32 -1.0, %v1102_v24  ;;  %1048 = vmatmul.mubr.bf16.gmra.mrb[4].mxu1 %v438_v40 }
 0x117   :  { %v1106_v44 = vpop.eup %1105  ;;  %v792_v45 = vadd.f32 -1.0, %v1104_v41  ;;  %v429_v43 = vsel %vm365_vm8, %v1246_v53, %v791_v39 }
 0x118   :  { %v790_v38 = vadd.f32 -1.0, %v1106_v44  ;;  %v427_v47 = vsel %vm363_vm10, %v1250_v58, %v789_v42 }
 0x119   :  { %v430_v46 = vsel %vm366_vm9, %v1254_v62, %v792_v45 }
 0x11a   :  { %v428_v48 = vsel %vm364_vm11, %v1258_v2, %v790_v38  ;;  %v440_v49 = vpack.c.bf16 %v430_v46, %v429_v43 }
 0x11b   :  { %v439_v50 = vpack.c.bf16 %v428_v48, %v427_v47 }
 0x11c   :  { %v1108_v51 = vpop.eup %1107  ;;  %953 = vst [vmem:[%s1349_s4 + $0x28] sm:$0xff] %v440_v49  }
 0x11d   :  { %v1110_v52 = vpop.eup %1109  ;;  %v795_v54 = vadd.f32 -1.0, %v1108_v51  ;;  %952 = vst [vmem:[%s1349_s4 + $0x20] sm:$0xff] %v439_v50   ;;  %1051 = vmatprep.mubr.bf16.mxu1 %v439_v50 }
 0x11e   :  { %v1112_v53 = vpop.eup %1111  ;;  %v793_v55 = vadd.f32 -1.0, %v1110_v52  ;;  %1052 = vmatmul.mubr.bf16.gmra.mrb[8].mxu1 %v440_v49 }
 0x11f   :  { %v1114_v56 = vpop.eup %1113  ;;  %v796_v57 = vadd.f32 -1.0, %v1112_v53  ;;  %v433_v59 = vsel %vm369_vm12, %v1269_v16, %v795_v54 }
 0x120   :  { %v794_v58 = vadd.f32 -1.0, %v1114_v56  ;;  %v431_v61 = vsel %vm367_vm14, %v1273_v20, %v793_v55 }
 0x121   :  { %v434_v60 = vsel %vm370_vm13, %v354_v26, %v796_v57 }
 0x122   :  { %v432_v62 = vsel %vm368_vm15, %v352_v29, %v794_v58  ;;  %v442_v63 = vpack.c.bf16 %v434_v60, %v433_v59 }
 0x123   :  { %v441_v0 = vpack.c.bf16 %v432_v62, %v431_v61 }
 0x124   :  { %955 = vst [vmem:[%s1349_s4 + $0x38] sm:$0xff] %v442_v63  }
 0x125   :  { %954 = vst [vmem:[%s1349_s4 + $0x30] sm:$0xff] %v441_v0   ;;  %1055 = vmatprep.mubr.bf16.mxu1 %v441_v0 }
 0x126   :  { %1056 = vmatmul.mubr.bf16.gmra.mrb[12].mxu1 %v442_v63 }
 0x1e1   :  { %v1045_v1 = vpop.f32.mrb[0].mxu1 }
 0x1e2   :  { %v613_v2 = vpop.f32.mrb[1].mxu1 }
 0x1e3   :  { %v1046_v3 = vpop.f32.mrb[2].mxu1 }
 0x1e4   :  { %v917_v4 = vpack.c.bf16 %v1046_v3, %v1045_v1  ;;  %v616_v5 = vpop.f32.mrb[3].mxu1 }
 0x1e5   :  { %v912_v6 = vpack.c.bf16 %v616_v5, %v613_v2 }
 0x1e6   :  { %956 = vst [vmem:[%s1350_s5 + $0x8] sm:$0xff] %v917_v4  }
 0x1e7   :  { %913 = vst [vmem:[%s1350_s5] sm:$0xff] %v912_v6  }
 0x1e9   :  { %v1049_v7 = vpop.f32.mrb[4].mxu1 }
 0x1ea   :  { %v629_v8 = vpop.f32.mrb[5].mxu1 }
 0x1eb   :  { %v1050_v9 = vpop.f32.mrb[6].mxu1 }
 0x1ec   :  { %v927_v10 = vpack.c.bf16 %v1050_v9, %v1049_v7  ;;  %v632_v11 = vpop.f32.mrb[7].mxu1 }
 0x1ed   :  { %v922_v12 = vpack.c.bf16 %v632_v11, %v629_v8 }
 0x1ee   :  { %958 = vst [vmem:[%s1350_s5 + $0x18] sm:$0xff] %v927_v10  }
 0x1ef   :  { %957 = vst [vmem:[%s1350_s5 + $0x10] sm:$0xff] %v922_v12  }
 0x1f1   :  { %v1053_v13 = vpop.f32.mrb[8].mxu1 }
 0x1f2   :  { %v645_v14 = vpop.f32.mrb[9].mxu1 }
 0x1f3   :  { %v1054_v15 = vpop.f32.mrb[10].mxu1 }
 0x1f4   :  { %v937_v16 = vpack.c.bf16 %v1054_v15, %v1053_v13  ;;  %v648_v17 = vpop.f32.mrb[11].mxu1 }
 0x1f5   :  { %v932_v18 = vpack.c.bf16 %v648_v17, %v645_v14 }
 0x1f6   :  { %960 = vst [vmem:[%s1350_s5 + $0x28] sm:$0xff] %v937_v16  }
 0x1f7   :  { %959 = vst [vmem:[%s1350_s5 + $0x20] sm:$0xff] %v932_v18  }
 0x1f9   :  { %v1057_v19 = vpop.f32.mrb[12].mxu1 }
 0x1fa   :  { %v661_v20 = vpop.f32.mrb[13].mxu1 }
 0x1fb   :  { %v1058_v21 = vpop.f32.mrb[14].mxu1 }
 0x1fc   :  { %v947_v22 = vpack.c.bf16 %v1058_v21, %v1057_v19  ;;  %v664_v23 = vpop.f32.mrb[15].mxu1 }
 0x1fd   :  { %v942_v25 = vpack.c.bf16 %v664_v23, %v661_v20 }
 0x1fe   :  { %962 = vst [vmem:[%s1350_s5 + $0x38] sm:$0xff] %v947_v22  }
 0x1ff   :  { %961 = vst [vmem:[%s1350_s5 + $0x30] sm:$0xff] %v942_v25  }

// kernel: _encoder_forward.6
= control target key start
LH: loop header
LB: loop body
LE: loop exit
PB: predicated region body
PF: predicated region fallthrough
CT: control target
= control target key end

     0   :  { %s1378_s1 = inlined_call_operand.vmem [shape: bf16[128,128], index: 1, kind: input, shape index: {}]   ;;  %s1379_s0 = inlined_call_operand.vmem [shape: bf16[128,128], index: 0, kind: input, shape index: {}]   ;;  %s1380_s5 = inlined_call_operand.vmem [shape: bf16[128,128], index: 5, kind: input, shape index: {}]   ;;  %s1381_s2 = inlined_call_operand.vmem [shape: f32[1,128], index: 2, kind: input, shape index: {}]   ;;  %s1382_s3 = inlined_call_operand.vmem [shape: bf16[128,128], index: 3, kind: input, shape index: {}]   ;;  %s1383_s4 = inlined_call_operand.<no memory space> [shape: f32[1], index: 4, kind: input, shape index: {}]   ;;  %s1384_s6 = inlined_call_operand.vmem [shape: bf16[128,128], index: 6, kind: output, shape index: {}]  }
   0x1   :  { %v1014_v0 = vld [vmem:[%s1378_s1] sm:$0xff]   ;;  %v1015_v1 = vld [vmem:[%s1378_s1 + $0x8] sm:$0xff]   ;;  %v1016_v2 = vld [vmem:[%s1378_s1 + $0x10] sm:$0xff]   ;;  %v1216_v45 = vstv %s1383_s4 }
   0x2   :  { %950 = vmatprep.subr.bf16.mxu0 %v1014_v0  ;;  %v1017_v3 = vld [vmem:[%s1378_s1 + $0x18] sm:$0xff]   ;;  %v1022_v4 = vld [vmem:[%s1379_s0] sm:$0xff]   ;;  %v1019_v6 = vld [vmem:[%s1378_s1 + $0x28] sm:$0xff]  }
   0x3   :  { %951 = vmatpush3.bf16.msra.mxu0 %v1014_v0  ;;  %966 = vmatprep.mubr.bf16.mxu0 %v1022_v4  ;;  %v1018_v5 = vld [vmem:[%s1378_s1 + $0x20] sm:$0xff]   ;;  %v1031_v8 = vld [vmem:[%s1380_s5 + $0x8] sm:$0xff]   ;;  %v1020_v9 = vld [vmem:[%s1378_s1 + $0x30] sm:$0xff]  }
   0x4   :  { %952 = vmatprep.subr.bf16.mxu0 %v1015_v1  ;;  %v1030_v7 = vld [vmem:[%s1380_s5] sm:$0xff]   ;;  %v1021_v10 = vld [vmem:[%s1378_s1 + $0x38] sm:$0xff]   ;;  %v1023_v11 = vld [vmem:[%s1379_s0 + $0x8] sm:$0xff]  }
   0x5   :  { %982 = vmatprep.subr.bf16.mxu1 %v1030_v7  ;;  %v1024_v12 = vld [vmem:[%s1379_s0 + $0x10] sm:$0xff]   ;;  %v1025_v13 = vld [vmem:[%s1379_s0 + $0x18] sm:$0xff]   ;;  %v1026_v14 = vld [vmem:[%s1379_s0 + $0x20] sm:$0xff]  }
   0x6   :  { %983 = vmatpush3.bf16.msra.mxu1 %v1030_v7  ;;  %v1027_v15 = vld [vmem:[%s1379_s0 + $0x28] sm:$0xff]   ;;  %v1028_v16 = vld [vmem:[%s1379_s0 + $0x30] sm:$0xff]   ;;  %v1029_v17 = vld [vmem:[%s1379_s0 + $0x38] sm:$0xff]  }
   0x7   :  { %953 = vmatpush3.bf16.msra.mxu0 %v1015_v1  ;;  %984 = vmatprep.subr.bf16.mxu1 %v1031_v8  ;;  %v1032_v18 = vld [vmem:[%s1380_s5 + $0x10] sm:$0xff]   ;;  %v1033_v19 = vld [vmem:[%s1380_s5 + $0x18] sm:$0xff]   ;;  %v1034_v20 = vld [vmem:[%s1380_s5 + $0x20] sm:$0xff]  }
   0x8   :  { %954 = vmatprep.subr.bf16.mxu0 %v1016_v2  ;;  %v1035_v21 = vld [vmem:[%s1380_s5 + $0x28] sm:$0xff]   ;;  %v1036_v22 = vld [vmem:[%s1380_s5 + $0x30] sm:$0xff]   ;;  %v1037_v23 = vld [vmem:[%s1380_s5 + $0x38] sm:$0xff]  }
   0x9   :  { %v1180_v24 = vld [vmem:[%s1381_s2] ss:$0 sm:$0xff]  ;;  %v904_v38 = vld [vmem:[%s1382_s3 + $0x8] sm:$0xff]   ;;  %v906_v39 = vld [vmem:[%s1382_s3 + $0x18] sm:$0xff]  }
   0xa   :  { %985 = vmatpush3.bf16.msra.mxu1 %v1031_v8  ;;  %v833_v37 = vld [vmem:[%s1382_s3] sm:$0xff]   ;;  %v905_v41 = vld [vmem:[%s1382_s3 + $0x10] sm:$0xff]   ;;  %v838_v46 = vunpack.c.l.bf16 %v904_v38  ;;  %v839_v50 = vunpack.c.h.bf16 %v904_v38  ;;  %v846_v51 = vunpack.c.l.bf16 %v906_v39  ;;  %v847_v56 = vunpack.c.h.bf16 %v906_v39  ;;  %v1235_v63 = vld [vmem:[%s1382_s3 + $0x28] sm:$0xff]  }
   0xb   :  { %955 = vmatpush3.bf16.msra.mxu0 %v1016_v2  ;;  %986 = vmatprep.subr.bf16.mxu1 %v1032_v18  ;;  %v834_v44 = vunpack.c.l.bf16 %v833_v37  ;;  %v835_v49 = vunpack.c.h.bf16 %v833_v37  ;;  %v842_v55 = vunpack.c.l.bf16 %v905_v41  ;;  %v843_v59 = vunpack.c.h.bf16 %v905_v41 }
   0xc   :  { %956 = vmatprep.subr.bf16.mxu0 %v1017_v3  ;;  %v476_v62 = vmul.f32 %v838_v46, %v1216_v45  ;;  %v477_v2 = vmul.f32 %v839_v50, %v1216_v45  ;;  %v1252_v7 = vmul.f32 %v847_v56, %v1216_v45 }
   0xd   :  { %v474_v61 = vmul.f32 %v834_v44, %v1216_v45  ;;  %v475_v1 = vmul.f32 %v835_v49, %v1216_v45 }
   0xe   :  { %987 = vmatpush3.bf16.msra.mxu1 %v1032_v18  ;;  %v855_v18 = vunpack.c.h.bf16 %v1235_v63 }
   0xf   :  { %957 = vmatpush3.bf16.msra.mxu0 %v1017_v3  ;;  %988 = vmatprep.subr.bf16.mxu1 %v1033_v19  ;;  %v1243_v3 = vld [vmem:[%s1382_s3 + $0x20] sm:$0xff]  }
  0x10   :  { %958 = vmatprep.subr.bf16.mxu0 %v1018_v5 }
  0x12   :  { %989 = vmatpush3.bf16.msra.mxu1 %v1033_v19 }
  0x13   :  { %959 = vmatpush3.bf16.msra.mxu0 %v1018_v5  ;;  %990 = vmatprep.subr.bf16.mxu1 %v1034_v20  ;;  %v1246_v5 = vmul.f32 %v842_v55, %v1216_v45 }
  0x14   :  { %960 = vmatprep.subr.bf16.mxu0 %v1019_v6 }
  0x16   :  { %991 = vmatpush3.bf16.msra.mxu1 %v1034_v20 }
  0x17   :  { %961 = vmatpush3.bf16.msra.mxu0 %v1019_v6  ;;  %992 = vmatprep.subr.bf16.mxu1 %v1035_v21  ;;  %v1249_v6 = vmul.f32 %v846_v51, %v1216_v45 }
  0x18   :  { %962 = vmatprep.subr.bf16.mxu0 %v1020_v9 }
  0x1a   :  { %993 = vmatpush3.bf16.msra.mxu1 %v1035_v21 }
  0x1b   :  { %963 = vmatpush3.bf16.msra.mxu0 %v1020_v9  ;;  %994 = vmatprep.subr.bf16.mxu1 %v1036_v22 }
  0x1c   :  { %964 = vmatprep.subr.bf16.mxu0 %v1021_v10 }
  0x1e   :  { %995 = vmatpush3.bf16.msra.mxu1 %v1036_v22 }
  0x1f   :  { %965 = vmatpush3.bf16.msra.mxu0 %v1021_v10  ;;  %996 = vmatprep.subr.bf16.mxu1 %v1037_v23 }
  0x22   :  { %967 = vmatmul.mubr.bf16.vlgmr.msra.gmra.mrb[0].mxu0 %v1023_v11  ;;  %997 = vmatpush3.bf16.msra.mxu1 %v1037_v23  ;;  %v1255_v11 = vmul.f32 %v843_v59, %v1216_v45 }
  0x23   :  { %970 = vmatprep.mubr.bf16.mxu0 %v1024_v12  ;;  %v854_v12 = vunpack.c.l.bf16 %v1235_v63  ;;  %v910_v63 = vld [vmem:[%s1382_s3 + $0x38] sm:$0xff]  }
  0x25   :  { %v1287_v39 = vmul.f32 %v854_v12, %v1216_v45 }
  0x2a   :  { %971 = vmatmul.mubr.bf16.gmra.mrb[4].mxu0 %v1025_v13 }
  0x2b   :  { %974 = vmatprep.mubr.bf16.mxu0 %v1026_v14 }
  0x32   :  { %975 = vmatmul.mubr.bf16.gmra.mrb[8].mxu0 %v1027_v15 }
  0x33   :  { %978 = vmatprep.mubr.bf16.mxu0 %v1028_v16 }
  0x3a   :  { %979 = vmatmul.mubr.bf16.gmra.mrb[12].mxu0 %v1029_v17  ;;  %v850_v17 = vunpack.c.l.bf16 %v1243_v3 }
  0xf5   :  { %v968_v25 = vpop.f32.mrb[0].mxu0 }
  0xf6   :  { %v1183_v26 = vadd.f32 %v968_v25, %v1180_v24  ;;  %v223_v27 = vpop.f32.mrb[1].mxu0 }
  0xf7   :  { %v1186_v28 = vadd.f32 %v1180_v24, %v223_v27  ;;  %v969_v29 = vpop.f32.mrb[2].mxu0 }
  0xf8   :  { %v380_v30 = vmul.f32 1.442695, %v1183_v26  ;;  %v1190_v31 = vadd.f32 %v969_v29, %v1180_v24  ;;  %v226_v32 = vpop.f32.mrb[3].mxu0  ;;  %vm362_vm0 = vcmp.gt.f32.partialorder %v1183_v26, 0.0 }
  0xf9   :  { %v376_v33 = vmul.f32 1.442695, %v1186_v28  ;;  %v1194_v34 = vadd.f32 %v1180_v24, %v226_v32  ;;  %vm360_vm1 = vcmp.gt.f32.partialorder %v1186_v28, 0.0 }
  0xfa   :  { %1038 = vpow2.f32 %v380_v30  ;;  %v382_v35 = vmul.f32 1.442695, %v1190_v31  ;;  %vm363_vm2 = vcmp.gt.f32.partialorder %v1190_v31, 0.0 }
  0xfb   :  { %1040 = vpow2.f32 %v376_v33  ;;  %v378_v36 = vmul.f32 1.442695, %v1194_v34  ;;  %vm361_vm3 = vcmp.gt.f32.partialorder %v1194_v34, 0.0 }
  0xfc   :  { %1042 = vpow2.f32 %v382_v35 }
  0xfd   :  { %1044 = vpow2.f32 %v378_v36  ;;  %v972_v40 = vpop.f32.mrb[4].mxu0 }
  0xfe   :  { %v1211_v42 = vadd.f32 %v972_v40, %v1180_v24  ;;  %v239_v43 = vpop.f32.mrb[5].mxu0 }
  0xff   :  { %v1219_v47 = vadd.f32 %v1180_v24, %v239_v43  ;;  %v973_v48 = vpop.f32.mrb[6].mxu0 }
 0x100   :  { %v388_v52 = vmul.f32 1.442695, %v1211_v42  ;;  %v1223_v53 = vadd.f32 %v973_v48, %v1180_v24  ;;  %v242_v54 = vpop.f32.mrb[7].mxu0  ;;  %vm366_vm4 = vcmp.gt.f32.partialorder %v1211_v42, 0.0 }
 0x101   :  { %v384_v57 = vmul.f32 1.442695, %v1219_v47  ;;  %v1227_v58 = vadd.f32 %v1180_v24, %v242_v54  ;;  %vm364_vm5 = vcmp.gt.f32.partialorder %v1219_v47, 0.0 }
 0x102   :  { %1046 = vpow2.f32 %v388_v52  ;;  %v390_v60 = vmul.f32 1.442695, %v1223_v53  ;;  %vm367_vm6 = vcmp.gt.f32.partialorder %v1223_v53, 0.0 }
 0x103   :  { %1048 = vpow2.f32 %v384_v57  ;;  %v386_v0 = vmul.f32 1.442695, %v1227_v58  ;;  %vm365_vm7 = vcmp.gt.f32.partialorder %v1227_v58, 0.0 }
 0x104   :  { %v1039_v4 = vpop.eup %1038  ;;  %1050 = vpow2.f32 %v390_v60 }
 0x105   :  { %v1041_v8 = vpop.eup %1040  ;;  %v778_v9 = vadd.f32 -1.0, %v1039_v4  ;;  %1052 = vpow2.f32 %v386_v0  ;;  %v976_v10 = vpop.f32.mrb[8].mxu0 }
 0x106   :  { %v1043_v13 = vpop.eup %1042  ;;  %v1259_v14 = vadd.f32 %v976_v10, %v1180_v24  ;;  %v255_v15 = vpop.f32.mrb[9].mxu0  ;;  %v776_v16 = vadd.f32 -1.0, %v1041_v8  ;;  %v851_v10 = vunpack.c.h.bf16 %v1243_v3 }
 0x107   :  { %v1045_v19 = vpop.eup %1044  ;;  %v779_v20 = vadd.f32 -1.0, %v1043_v13  ;;  %v1266_v21 = vadd.f32 %v1180_v24, %v255_v15  ;;  %v977_v22 = vpop.f32.mrb[10].mxu0  ;;  %v426_v30 = vsel %vm362_vm0, %v1183_v26, %v778_v9 }
 0x108   :  { %v396_v23 = vmul.f32 1.442695, %v1259_v14  ;;  %v1271_v25 = vadd.f32 %v977_v22, %v1180_v24  ;;  %v258_v27 = vpop.f32.mrb[11].mxu0  ;;  %v777_v29 = vadd.f32 -1.0, %v1045_v19  ;;  %v424_v37 = vsel %vm360_vm1, %v1186_v28, %v776_v16 }
 0x109   :  { %v392_v32 = vmul.f32 1.442695, %v1266_v21  ;;  %v1277_v33 = vadd.f32 %v1180_v24, %v258_v27  ;;  %v427_v35 = vsel %vm363_vm2, %v1190_v31, %v779_v20  ;;  %v490_v31 = vadd.f32 %v474_v61, %v424_v37 }
 0x10a   :  { %1054 = vpow2.f32 %v396_v23  ;;  %v398_v36 = vmul.f32 1.442695, %v1271_v25  ;;  %v425_v26 = vsel %vm361_vm3, %v1194_v34, %v777_v29  ;;  %v492_v48 = vadd.f32 %v476_v62, %v426_v30  ;;  %v909_v30 = vld [vmem:[%s1382_s3 + $0x30] sm:$0xff]  }
 0x10b   :  { %1056 = vpow2.f32 %v392_v32  ;;  %v394_v38 = vmul.f32 1.442695, %v1277_v33  ;;  %v491_v41 = vadd.f32 %v475_v1, %v425_v26  ;;  %v493_v28 = vadd.f32 %v477_v2, %v427_v35 }
 0x10c   :  { %v1047_v40 = vpop.eup %1046  ;;  %1058 = vpow2.f32 %v398_v36  ;;  %vm370_vm8 = vcmp.gt.f32.partialorder %v1259_v14, 0.0  ;;  %vm368_vm9 = vcmp.gt.f32.partialorder %v1266_v21, 0.0  ;;  %vm371_vm10 = vcmp.gt.f32.partialorder %v1271_v25, 0.0 }
 0x10d   :  { %v1049_v43 = vpop.eup %1048  ;;  %v782_v44 = vadd.f32 -1.0, %v1047_v40  ;;  %1060 = vpow2.f32 %v394_v38  ;;  %v980_v46 = vpop.f32.mrb[12].mxu0  ;;  %v506_v52 = vpack.c.bf16 %v491_v41, %v490_v31  ;;  %v507_v59 = vpack.c.bf16 %v493_v28, %v492_v48 }
 0x10e   :  { %v1051_v49 = vpop.eup %1050  ;;  %v780_v50 = vadd.f32 -1.0, %v1049_v43  ;;  %v1292_v34 = vadd.f32 %v980_v46, %v1180_v24  ;;  %v271_v51 = vpop.f32.mrb[13].mxu0  ;;  %vm369_vm11 = vcmp.gt.f32.partialorder %v1277_v33, 0.0  ;;  %v862_v37 = vunpack.c.l.bf16 %v910_v63 }
 0x10f   :  { %v1053_v54 = vpop.eup %1052  ;;  %v783_v55 = vadd.f32 -1.0, %v1051_v49  ;;  %v1296_v56 = vadd.f32 %v1180_v24, %v271_v51  ;;  %v981_v57 = vpop.f32.mrb[14].mxu0  ;;  %998 = vmatprep.mubr.bf16.mxu1 %v506_v52  ;;  %v430_v1 = vsel %vm366_vm4, %v1211_v42, %v782_v44  ;;  %v858_v26 = vunpack.c.l.bf16 %v909_v30 }
 0x110   :  { %v428_v60 = vsel %vm364_vm5, %v1219_v47, %v780_v50  ;;  %v781_v61 = vadd.f32 -1.0, %v1053_v54  ;;  %v404_v62 = vmul.f32 1.442695, %v1292_v34  ;;  %v274_v0 = vpop.f32.mrb[15].mxu0  ;;  %v1307_v8 = vadd.f32 %v981_v57, %v1180_v24  ;;  %999 = vmatmul.mubr.bf16.vlgmr.msra.gmra.mrb[0].mxu1 %v507_v59 }
 0x111   :  { %v431_v2 = vsel %vm367_vm6, %v1223_v53, %v783_v55  ;;  %v400_v4 = vmul.f32 1.442695, %v1296_v56  ;;  %v1311_v9 = vadd.f32 %v1180_v24, %v274_v0  ;;  %v494_v42 = vadd.f32 %v1246_v5, %v428_v60 }
 0x112   :  { %v429_v47 = vsel %vm365_vm7, %v1227_v58, %v781_v61  ;;  %1062 = vpow2.f32 %v404_v62  ;;  %v406_v12 = vmul.f32 1.442695, %v1307_v8  ;;  %v496_v16 = vadd.f32 %v1249_v6, %v430_v1 }
 0x113   :  { %1064 = vpow2.f32 %v400_v4  ;;  %v495_v53 = vadd.f32 %v1255_v11, %v429_v47  ;;  %v402_v15 = vmul.f32 1.442695, %v1311_v9  ;;  %v497_v58 = vadd.f32 %v1252_v7, %v431_v2 }
 0x114   :  { %v1055_v13 = vpop.eup %1054  ;;  %v482_v24 = vmul.f32 %v850_v17, %v1216_v45  ;;  %1066 = vpow2.f32 %v406_v12  ;;  %v485_v5 = vmul.f32 %v855_v18, %v1216_v45  ;;  %v483_v17 = vmul.f32 %v851_v10, %v1216_v45 }
 0x115   :  { %v1057_v19 = vpop.eup %1056  ;;  %v786_v20 = vadd.f32 -1.0, %v1055_v13  ;;  %v508_v22 = vpack.c.bf16 %v495_v53, %v494_v42  ;;  %1068 = vpow2.f32 %v402_v15  ;;  %v509_v6 = vpack.c.bf16 %v497_v58, %v496_v16 }
 0x116   :  { %v1059_v11 = vpop.eup %1058  ;;  %v784_v23 = vadd.f32 -1.0, %v1057_v19  ;;  %v863_v40 = vunpack.c.h.bf16 %v910_v63  ;;  %v859_v43 = vunpack.c.h.bf16 %v909_v30  ;;  %vm374_vm12 = vcmp.gt.f32.partialorder %v1292_v34, 0.0 }
 0x117   :  { %v1061_v27 = vpop.eup %1060  ;;  %v434_v7 = vsel %vm370_vm8, %v1259_v14, %v786_v20  ;;  %v787_v3 = vadd.f32 -1.0, %v1059_v11  ;;  %1002 = vmatprep.mubr.bf16.mxu1 %v508_v22  ;;  %vm372_vm13 = vcmp.gt.f32.partialorder %v1296_v56, 0.0  ;;  %vm375_vm14 = vcmp.gt.f32.partialorder %v1307_v8, 0.0 }
 0x118   :  { %v432_v18 = vsel %vm368_vm9, %v1266_v21, %v784_v23  ;;  %v785_v29 = vadd.f32 -1.0, %v1061_v27  ;;  %1003 = vmatmul.mubr.bf16.gmra.mrb[4].mxu1 %v509_v6  ;;  %v500_v35 = vadd.f32 %v1287_v39, %v434_v7  ;;  %v488_v39 = vmul.f32 %v862_v37, %v1216_v45 }
 0x119   :  { %v435_v14 = vsel %vm371_vm10, %v1271_v25, %v787_v3  ;;  %v498_v38 = vadd.f32 %v482_v24, %v432_v18  ;;  %v489_v49 = vmul.f32 %v863_v40, %v1216_v45  ;;  %v487_v54 = vmul.f32 %v859_v43, %v1216_v45 }
 0x11a   :  { %v433_v32 = vsel %vm369_vm11, %v1277_v33, %v785_v29  ;;  %v501_v36 = vadd.f32 %v485_v5, %v435_v14  ;;  %v486_v33 = vmul.f32 %v858_v26, %v1216_v45  ;;  %vm373_vm15 = vcmp.gt.f32.partialorder %v1311_v9, 0.0 }
 0x11b   :  { %v499_v21 = vadd.f32 %v483_v17, %v433_v32 }
 0x11c   :  { %v1063_v31 = vpop.eup %1062  ;;  %v511_v41 = vpack.c.bf16 %v501_v36, %v500_v35 }
 0x11d   :  { %v1065_v44 = vpop.eup %1064  ;;  %v790_v46 = vadd.f32 -1.0, %v1063_v31  ;;  %v510_v48 = vpack.c.bf16 %v499_v21, %v498_v38 }
 0x11e   :  { %v788_v25 = vadd.f32 -1.0, %v1065_v44  ;;  %v1067_v28 = vpop.eup %1066 }
 0x11f   :  { %1006 = vmatprep.mubr.bf16.mxu1 %v510_v48  ;;  %v1069_v50 = vpop.eup %1068  ;;  %v438_v51 = vsel %vm374_vm12, %v1292_v34, %v790_v46  ;;  %v791_v52 = vadd.f32 -1.0, %v1067_v28 }
 0x120   :  { %v436_v55 = vsel %vm372_vm13, %v1296_v56, %v788_v25  ;;  %v789_v57 = vadd.f32 -1.0, %v1069_v50  ;;  %1007 = vmatmul.mubr.bf16.gmra.mrb[8].mxu1 %v511_v41  ;;  %v504_v61 = vadd.f32 %v488_v39, %v438_v51 }
 0x121   :  { %v439_v59 = vsel %vm375_vm14, %v1307_v8, %v791_v52  ;;  %v502_v34 = vadd.f32 %v486_v33, %v436_v55 }
 0x122   :  { %v437_v60 = vsel %vm373_vm15, %v1311_v9, %v789_v57  ;;  %v505_v62 = vadd.f32 %v489_v49, %v439_v59 }
 0x123   :  { %v503_v0 = vadd.f32 %v487_v54, %v437_v60 }
 0x124   :  { %v513_v1 = vpack.c.bf16 %v505_v62, %v504_v61 }
 0x125   :  { %v512_v2 = vpack.c.bf16 %v503_v0, %v502_v34 }
 0x127   :  { %1010 = vmatprep.mubr.bf16.mxu1 %v512_v2 }
 0x128   :  { %1011 = vmatmul.mubr.bf16.gmra.mrb[12].mxu1 %v513_v1 }
 0x1e3   :  { %v1000_v45 = vpop.f32.mrb[0].mxu1 }
 0x1e4   :  { %v612_v56 = vpop.f32.mrb[1].mxu1 }
 0x1e5   :  { %v1001_v4 = vpop.f32.mrb[2].mxu1 }
 0x1e6   :  { %v872_v47 = vpack.c.bf16 %v1001_v4, %v1000_v45  ;;  %v615_v10 = vpop.f32.mrb[3].mxu1 }
 0x1e7   :  { %v867_v12 = vpack.c.bf16 %v615_v10, %v612_v56 }
 0x1e8   :  { %911 = vst [vmem:[%s1384_s6 + $0x8] sm:$0xff] %v872_v47  }
 0x1e9   :  { %868 = vst [vmem:[%s1384_s6] sm:$0xff] %v867_v12  }
 0x1eb   :  { %v1004_v8 = vpop.f32.mrb[4].mxu1 }
 0x1ec   :  { %v628_v9 = vpop.f32.mrb[5].mxu1 }
 0x1ed   :  { %v1005_v42 = vpop.f32.mrb[6].mxu1 }
 0x1ee   :  { %v882_v53 = vpack.c.bf16 %v1005_v42, %v1004_v8  ;;  %v631_v13 = vpop.f32.mrb[7].mxu1 }
 0x1ef   :  { %v877_v15 = vpack.c.bf16 %v631_v13, %v628_v9 }
 0x1f0   :  { %913 = vst [vmem:[%s1384_s6 + $0x18] sm:$0xff] %v882_v53  }
 0x1f1   :  { %912 = vst [vmem:[%s1384_s6 + $0x10] sm:$0xff] %v877_v15  }
 0x1f3   :  { %v1008_v16 = vpop.f32.mrb[8].mxu1 }
 0x1f4   :  { %v644_v58 = vpop.f32.mrb[9].mxu1 }
 0x1f5   :  { %v1009_v24 = vpop.f32.mrb[10].mxu1 }
 0x1f6   :  { %v892_v19 = vpack.c.bf16 %v1009_v24, %v1008_v16  ;;  %v647_v20 = vpop.f32.mrb[11].mxu1 }
 0x1f7   :  { %v887_v22 = vpack.c.bf16 %v647_v20, %v644_v58 }
 0x1f8   :  { %915 = vst [vmem:[%s1384_s6 + $0x28] sm:$0xff] %v892_v19  }
 0x1f9   :  { %914 = vst [vmem:[%s1384_s6 + $0x20] sm:$0xff] %v887_v22  }
 0x1fb   :  { %v1012_v5 = vpop.f32.mrb[12].mxu1 }
 0x1fc   :  { %v660_v11 = vpop.f32.mrb[13].mxu1 }
 0x1fd   :  { %v1013_v23 = vpop.f32.mrb[14].mxu1 }
 0x1fe   :  { %v902_v6 = vpack.c.bf16 %v1013_v23, %v1012_v5  ;;  %v663_v27 = vpop.f32.mrb[15].mxu1 }
 0x1ff   :  { %v897_v7 = vpack.c.bf16 %v663_v27, %v660_v11 }
 0x200   :  { %917 = vst [vmem:[%s1384_s6 + $0x38] sm:$0xff] %v902_v6  }
 0x201   :  { %916 = vst [vmem:[%s1384_s6 + $0x30] sm:$0xff] %v897_v7  }

</bundles_post_ra>
